<compile_context>
chip_gen: v5e
topology: v5e:2x2
jax: 0.10.0
libtpu: 0.0.40
codegen_flags: <defaults>
</compile_context>

<pallas_src>
import math

import jax
import jax.numpy as jnp
from jax.experimental import pallas as pl
from jax.experimental.pallas import tpu as pltpu

_LANE = 128
_SUBLANE = 8


def _round_up(x, m):
    return ((x + m - 1) // m) * m


def _make_actor_kernel(num_hidden, max_action, eps=1e-5):
    """Build a kernel closure for a fixed number of hidden layers."""

    def kernel(x_ref, *refs):
        # refs = [w1, bgb1, w2, bgb2, ..., w_mu, b_mu, out]
        out_ref = refs[-1]
        h = x_ref[...]
        if h.dtype != jnp.float32:            # gate redundant cast on dtype
            h = h.astype(jnp.float32)
        idx = 0
        for _ in range(num_hidden):
            w = refs[idx][...]                # (prev_dim, dim), compute dtype
            bgb = refs[idx + 1][...]          # (3, dim) f32: [bias; gamma; beta]
            idx += 2
            b = bgb[0:1, :]
            gamma = bgb[1:2, :]
            beta = bgb[2:3, :]
            # Linear on the MXU (bf16 operands, f32 accumulation).
            y = jnp.dot(h.astype(w.dtype), w,
                        preferred_element_type=jnp.float32) + b
            # Fused LayerNorm statistics in f32 (single sweep: E[x], E[x^2]).
            mean = jnp.mean(y, axis=-1, keepdims=True)
            mean_sq = jnp.mean(y * y, axis=-1, keepdims=True)
            var = mean_sq - mean * mean
            h = (y - mean) * jax.lax.rsqrt(var + eps)
            h = h * gamma + beta
            # ReLU
            h = jnp.maximum(h, 0.0)
        w_mu = refs[idx][...]                 # (prev_dim, act_pad), compute dtype
        b_mu = refs[idx + 1][...]             # (1, act_pad) f32 (zero padded)
        logits = jnp.dot(h.astype(w_mu.dtype), w_mu,
                         preferred_element_type=jnp.float32) + b_mu
        # Lane-dense store: act_pad is a multiple of 128 -> unmasked vst.
        out_ref[...] = (jnp.tanh(logits) * max_action).astype(out_ref.dtype)

    return kernel


def actor_forward(states, params, *, max_action, batch_tile=512,
                  compute_dtype=jnp.bfloat16, vmem_limit_bytes=None):
    """Actor forward pass.

    params: list of (w, b, gamma, beta) per hidden layer + final (w_mu, b_mu),
    all float32, with weights stored as (in_features, out_features).
    """
    num_hidden = len(params) - 1
    batch, input_dim = states.shape
    action_dim = params[-1][0].shape[1]
    act_pad = _round_up(action_dim, _LANE)    # lane-dense output width

    # ---- pack / cast parameters (resident in VMEM across the whole grid) ----
    flat = []
    weight_specs = []
    for (w, b, gamma, beta) in params[:-1]:
        w_c = w.astype(compute_dtype)
        bgb = jnp.concatenate([b, gamma, beta], axis=0).astype(jnp.float32)
        flat.append(w_c)
        weight_specs.append(pl.BlockSpec(tuple(w_c.shape), lambda i: (0, 0)))
        flat.append(bgb)
        weight_specs.append(pl.BlockSpec(tuple(bgb.shape), lambda i: (0, 0)))
    w_mu, b_mu = params[-1]
    prev_dim = w_mu.shape[0]
    w_mu_p = jnp.pad(w_mu, ((0, 0), (0, act_pad - action_dim))).astype(compute_dtype)
    b_mu_p = jnp.pad(b_mu, ((0, 0), (0, act_pad - action_dim))).astype(jnp.float32)
    flat.append(w_mu_p)
    weight_specs.append(pl.BlockSpec((prev_dim, act_pad), lambda i: (0, 0)))
    flat.append(b_mu_p)
    weight_specs.append(pl.BlockSpec((1, act_pad), lambda i: (0, 0)))

    # ---- batch tiling (grid over batch, padded so the grid divides evenly) ----
    tile = min(batch_tile, _round_up(batch, _SUBLANE))
    tile = max(_SUBLANE, _round_up(tile, _SUBLANE))
    padded_batch = _round_up(batch, tile)
    if padded_batch != batch:
        states = jnp.pad(states, ((0, padded_batch - batch), (0, 0)))
    grid = (padded_batch // tile,)

    cp_kwargs = dict(dimension_semantics=("parallel",))
    if vmem_limit_bytes is not None:
        cp_kwargs["vmem_limit_bytes"] = vmem_limit_bytes

    kernel = _make_actor_kernel(num_hidden, max_action)
    out = pl.pallas_call(
        kernel,
        out_shape=jax.ShapeDtypeStruct((padded_batch, act_pad), jnp.float32),
        grid=grid,
        in_specs=[pl.BlockSpec((tile, input_dim), lambda i: (i, 0))] + weight_specs,
        out_specs=pl.BlockSpec((tile, act_pad), lambda i: (i, 0)),
        compiler_params=pltpu.CompilerParams(**cp_kwargs),
    )(states, *flat)
    return out[:batch, :action_dim]


def init_actor_params(key, input_dim, action_dim, hidden_dims, final_init):
    """Deterministic init mirroring Actor.__init__ / _init_weights shapes."""
    params = []
    prev_dim = input_dim
    enc_b = 1.0 / math.sqrt(hidden_dims[-2])
    for dim in hidden_dims:
        key, k_w, k_b = jax.random.split(key, 3)
        w = jax.random.uniform(k_w, (prev_dim, dim), jnp.float32, -enc_b, enc_b)
        bound = 1.0 / math.sqrt(prev_dim)
        b = jax.random.uniform(k_b, (1, dim), jnp.float32, -bound, bound)
        key, k_g = jax.random.split(key)
        gamma = jax.random.uniform(k_g, (1, dim), jnp.float32, -enc_b, enc_b)
        beta = jnp.zeros((1, dim), jnp.float32)   # LayerNorm bias default init
        params.append((w, b, gamma, beta))
        prev_dim = dim
    key, k_w, k_b = jax.random.split(key, 3)
    w_mu = jax.random.uniform(
        k_w, (prev_dim, action_dim), jnp.float32, -final_init, final_init
    )
    bound = 1.0 / math.sqrt(prev_dim)
    b_mu = jax.random.uniform(k_b, (1, action_dim), jnp.float32, -bound, bound)
    params.append((w_mu, b_mu))
    return params


def actor_forward_ref(states, params, *, max_action, eps=1e-5):
    """Pure-JAX f32 reference for correctness checking."""
    h = states.astype(jnp.float32)
    for w, b, gamma, beta in params[:-1]:
        h = h @ w + b
        mean = jnp.mean(h, axis=-1, keepdims=True)
        var = jnp.mean((h - mean) ** 2, axis=-1, keepdims=True)
        h = (h - mean) * jax.lax.rsqrt(var + eps) * gamma + beta
        h = jnp.maximum(h, 0.0)
    w_mu, b_mu = params[-1]
    return jnp.tanh(h @ w_mu + b_mu) * max_action


if __name__ == "__main__":
    # Small shapes consistent with the module's forward pass; batch_tile=128
    # gives a 2-step batch grid that exercises pipelining + weight residency.
    batch = 256
    input_dim = 32
    hidden_dims = (64, 32)
    action_dim = 8
    max_action = 2.0
    final_init = 3e-3

    key = jax.random.PRNGKey(0)
    key, k_x = jax.random.split(key)
    states = jax.random.normal(k_x, (batch, input_dim), jnp.float32)

    params = init_actor_params(key, input_dim, action_dim, hidden_dims, final_init)

    out = actor_forward(states, params, max_action=max_action, batch_tile=128)
    out = jax.block_until_ready(out)

    ref = actor_forward_ref(states, params, max_action=max_action)
    assert out.shape == (batch, action_dim)
    # bf16 matmul inputs with f32 accumulation vs. full-f32 reference.
    assert jnp.allclose(out, ref, atol=1e-2, rtol=1e-2), (
        f"mismatch: max abs err {jnp.max(jnp.abs(out - ref))}"
    )
    print("KERNEL_OK")
</pallas_src>

<mosaic_0001>
module attributes {stable_mosaic.version = 11 : i64} {
  func.func @kernel(%arg0: i32, %arg1: memref<128x32xf32, #tpu.memory_space<vmem>>, %arg2: memref<32x64xbf16, #tpu.memory_space<vmem>>, %arg3: memref<3x64xf32, #tpu.memory_space<vmem>>, %arg4: memref<64x32xbf16, #tpu.memory_space<vmem>>, %arg5: memref<3x32xf32, #tpu.memory_space<vmem>>, %arg6: memref<32x128xbf16, #tpu.memory_space<vmem>>, %arg7: memref<1x128xf32, #tpu.memory_space<vmem>>, %arg8: memref<128x128xf32, #tpu.memory_space<vmem>>) attributes {dimension_semantics = [#tpu.dimension_semantics<parallel>], iteration_bounds = array<i64: 2>, scalar_prefetch = 0 : i64, scratch_operands = 0 : i64, tpu.core_type = #tpu.core_type<tc>, window_params = [{transform_indices = @transform_0, window_bounds = array<i64: 128, 32>}, {pipeline_mode = #tpu.pipeline_mode<synchronous>, transform_indices = @transform_1, window_bounds = array<i64: 32, 64>}, {pipeline_mode = #tpu.pipeline_mode<synchronous>, transform_indices = @transform_2, window_bounds = array<i64: 3, 64>}, {pipeline_mode = #tpu.pipeline_mode<synchronous>, transform_indices = @transform_3, window_bounds = array<i64: 64, 32>}, {pipeline_mode = #tpu.pipeline_mode<synchronous>, transform_indices = @transform_4, window_bounds = array<i64: 3, 32>}, {pipeline_mode = #tpu.pipeline_mode<synchronous>, transform_indices = @transform_5, window_bounds = array<i64: 32, 128>}, {pipeline_mode = #tpu.pipeline_mode<synchronous>, transform_indices = @transform_6, window_bounds = array<i64: 1, 128>}, {transform_indices = @transform_7, window_bounds = array<i64: 128, 128>}]} {
    %c0 = arith.constant 0 : index
    %c0_0 = arith.constant 0 : index
    %0 = vector.load %arg1[%c0, %c0_0] : memref<128x32xf32, #tpu.memory_space<vmem>>, vector<128x32xf32>
    %c0_1 = arith.constant 0 : index
    %c0_2 = arith.constant 0 : index
    %1 = vector.load %arg2[%c0_1, %c0_2] : memref<32x64xbf16, #tpu.memory_space<vmem>>, vector<32x64xbf16>
    %c0_3 = arith.constant 0 : index
    %c0_4 = arith.constant 0 : index
    %2 = vector.load %arg3[%c0_3, %c0_4] : memref<3x64xf32, #tpu.memory_space<vmem>>, vector<3x64xf32>
    %3 = vector.extract_strided_slice %2 {offsets = [0, 0], sizes = [1, 64], strides = [1, 1]} : vector<3x64xf32> to vector<1x64xf32>
    %4 = vector.extract_strided_slice %2 {offsets = [1, 0], sizes = [1, 64], strides = [1, 1]} : vector<3x64xf32> to vector<1x64xf32>
    %5 = vector.extract_strided_slice %2 {offsets = [2, 0], sizes = [1, 64], strides = [1, 1]} : vector<3x64xf32> to vector<1x64xf32>
    %6 = arith.truncf %0 : vector<128x32xf32> to vector<128x32xbf16>
    %cst = arith.constant dense<0.000000e+00> : vector<128x64xf32>
    %7 = tpu.matmul %6, %1, %cst {dimension_numbers = #tpu.dot_dimension_numbers<[1], [0], [0], [1], [0, 0, 1, 1], [], []>} : vector<128x32xbf16>, vector<32x64xbf16>, vector<128x64xf32> -> vector<128x64xf32>
    %8 = vector.broadcast %3 : vector<1x64xf32> to vector<128x64xf32>
    %9 = arith.addf %7, %8 : vector<128x64xf32>
    %cst_5 = arith.constant dense<0.000000e+00> : vector<128xf32>
    %10 = vector.multi_reduction <add>, %9, %cst_5 [1] : vector<128x64xf32> to vector<128xf32>
    %11 = vector.shape_cast %10 : vector<128xf32> to vector<128x1xf32>
    %cst_6 = arith.constant 6.400000e+01 : f32
    %12 = vector.broadcast %cst_6 : f32 to vector<128x1xf32>
    %13 = arith.divf %11, %12 : vector<128x1xf32>
    %14 = arith.mulf %9, %9 : vector<128x64xf32>
    %cst_7 = arith.constant dense<0.000000e+00> : vector<128xf32>
    %15 = vector.multi_reduction <add>, %14, %cst_7 [1] : vector<128x64xf32> to vector<128xf32>
    %16 = vector.shape_cast %15 : vector<128xf32> to vector<128x1xf32>
    %cst_8 = arith.constant 6.400000e+01 : f32
    %17 = vector.broadcast %cst_8 : f32 to vector<128x1xf32>
    %18 = arith.divf %16, %17 : vector<128x1xf32>
    %19 = arith.mulf %13, %13 : vector<128x1xf32>
    %20 = arith.subf %18, %19 : vector<128x1xf32>
    %21 = vector.broadcast %13 : vector<128x1xf32> to vector<128x64xf32>
    %22 = arith.subf %9, %21 : vector<128x64xf32>
    %cst_9 = arith.constant 9.99999974E-6 : f32
    %23 = vector.broadcast %cst_9 : f32 to vector<128x1xf32>
    %24 = arith.addf %20, %23 : vector<128x1xf32>
    %25 = math.rsqrt %24 : vector<128x1xf32>
    %26 = vector.broadcast %25 : vector<128x1xf32> to vector<128x64xf32>
    %27 = arith.mulf %22, %26 : vector<128x64xf32>
    %28 = vector.broadcast %4 : vector<1x64xf32> to vector<128x64xf32>
    %29 = arith.mulf %27, %28 : vector<128x64xf32>
    %30 = vector.broadcast %5 : vector<1x64xf32> to vector<128x64xf32>
    %31 = arith.addf %29, %30 : vector<128x64xf32>
    %cst_10 = arith.constant 0.000000e+00 : f32
    %32 = vector.broadcast %cst_10 : f32 to vector<128x64xf32>
    %33 = arith.maximumf %31, %32 : vector<128x64xf32>
    %c0_11 = arith.constant 0 : index
    %c0_12 = arith.constant 0 : index
    %34 = vector.load %arg4[%c0_11, %c0_12] : memref<64x32xbf16, #tpu.memory_space<vmem>>, vector<64x32xbf16>
    %c0_13 = arith.constant 0 : index
    %c0_14 = arith.constant 0 : index
    %35 = vector.load %arg5[%c0_13, %c0_14] : memref<3x32xf32, #tpu.memory_space<vmem>>, vector<3x32xf32>
    %36 = vector.extract_strided_slice %35 {offsets = [0, 0], sizes = [1, 32], strides = [1, 1]} : vector<3x32xf32> to vector<1x32xf32>
    %37 = vector.extract_strided_slice %35 {offsets = [1, 0], sizes = [1, 32], strides = [1, 1]} : vector<3x32xf32> to vector<1x32xf32>
    %38 = vector.extract_strided_slice %35 {offsets = [2, 0], sizes = [1, 32], strides = [1, 1]} : vector<3x32xf32> to vector<1x32xf32>
    %39 = arith.truncf %33 : vector<128x64xf32> to vector<128x64xbf16>
    %cst_15 = arith.constant dense<0.000000e+00> : vector<128x32xf32>
    %40 = tpu.matmul %39, %34, %cst_15 {dimension_numbers = #tpu.dot_dimension_numbers<[1], [0], [0], [1], [0, 0, 1, 1], [], []>} : vector<128x64xbf16>, vector<64x32xbf16>, vector<128x32xf32> -> vector<128x32xf32>
    %41 = vector.broadcast %36 : vector<1x32xf32> to vector<128x32xf32>
    %42 = arith.addf %40, %41 : vector<128x32xf32>
    %cst_16 = arith.constant dense<0.000000e+00> : vector<128xf32>
    %43 = vector.multi_reduction <add>, %42, %cst_16 [1] : vector<128x32xf32> to vector<128xf32>
    %44 = vector.shape_cast %43 : vector<128xf32> to vector<128x1xf32>
    %cst_17 = arith.constant 3.200000e+01 : f32
    %45 = vector.broadcast %cst_17 : f32 to vector<128x1xf32>
    %46 = arith.divf %44, %45 : vector<128x1xf32>
    %47 = arith.mulf %42, %42 : vector<128x32xf32>
    %cst_18 = arith.constant dense<0.000000e+00> : vector<128xf32>
    %48 = vector.multi_reduction <add>, %47, %cst_18 [1] : vector<128x32xf32> to vector<128xf32>
    %49 = vector.shape_cast %48 : vector<128xf32> to vector<128x1xf32>
    %cst_19 = arith.constant 3.200000e+01 : f32
    %50 = vector.broadcast %cst_19 : f32 to vector<128x1xf32>
    %51 = arith.divf %49, %50 : vector<128x1xf32>
    %52 = arith.mulf %46, %46 : vector<128x1xf32>
    %53 = arith.subf %51, %52 : vector<128x1xf32>
    %54 = vector.broadcast %46 : vector<128x1xf32> to vector<128x32xf32>
    %55 = arith.subf %42, %54 : vector<128x32xf32>
    %cst_20 = arith.constant 9.99999974E-6 : f32
    %56 = vector.broadcast %cst_20 : f32 to vector<128x1xf32>
    %57 = arith.addf %53, %56 : vector<128x1xf32>
    %58 = math.rsqrt %57 : vector<128x1xf32>
    %59 = vector.broadcast %58 : vector<128x1xf32> to vector<128x32xf32>
    %60 = arith.mulf %55, %59 : vector<128x32xf32>
    %61 = vector.broadcast %37 : vector<1x32xf32> to vector<128x32xf32>
    %62 = arith.mulf %60, %61 : vector<128x32xf32>
    %63 = vector.broadcast %38 : vector<1x32xf32> to vector<128x32xf32>
    %64 = arith.addf %62, %63 : vector<128x32xf32>
    %cst_21 = arith.constant 0.000000e+00 : f32
    %65 = vector.broadcast %cst_21 : f32 to vector<128x32xf32>
    %66 = arith.maximumf %64, %65 : vector<128x32xf32>
    %c0_22 = arith.constant 0 : index
    %c0_23 = arith.constant 0 : index
    %67 = vector.load %arg6[%c0_22, %c0_23] : memref<32x128xbf16, #tpu.memory_space<vmem>>, vector<32x128xbf16>
    %c0_24 = arith.constant 0 : index
    %c0_25 = arith.constant 0 : index
    %68 = vector.load %arg7[%c0_24, %c0_25] : memref<1x128xf32, #tpu.memory_space<vmem>>, vector<1x128xf32>
    %69 = arith.truncf %66 : vector<128x32xf32> to vector<128x32xbf16>
    %cst_26 = arith.constant dense<0.000000e+00> : vector<128x128xf32>
    %70 = tpu.matmul %69, %67, %cst_26 {dimension_numbers = #tpu.dot_dimension_numbers<[1], [0], [0], [1], [0, 0, 1, 1], [], []>} : vector<128x32xbf16>, vector<32x128xbf16>, vector<128x128xf32> -> vector<128x128xf32>
    %71 = vector.broadcast %68 : vector<1x128xf32> to vector<128x128xf32>
    %72 = arith.addf %70, %71 : vector<128x128xf32>
    %73 = math.tanh %72 : vector<128x128xf32>
    %cst_27 = arith.constant 2.000000e+00 : f32
    %74 = vector.broadcast %cst_27 : f32 to vector<128x128xf32>
    %75 = arith.mulf %73, %74 : vector<128x128xf32>
    %c0_28 = arith.constant 0 : index
    %c0_29 = arith.constant 0 : index
    %76 = vector.load %arg8[%c0_28, %c0_29] : memref<128x128xf32, #tpu.memory_space<vmem>>, vector<128x128xf32>
    tpu.vector_store %arg8[%c0_28, %c0_29], %75 {strides = array<i32>} : memref<128x128xf32, #tpu.memory_space<vmem>>, vector<128x128xf32>,
    return
  }
  func.func @transform_0(%arg0: i32) -> (i32, i32) {
    %c0_i32 = arith.constant 0 : i32
    %c0_i32_0 = arith.constant 0 : i32
    return %arg0, %c0_i32 : i32, i32
  }
  func.func @transform_1(%arg0: i32) -> (i32, i32) {
    %c0_i32 = arith.constant 0 : i32
    %c0_i32_0 = arith.constant 0 : i32
    %c0_i32_1 = arith.constant 0 : i32
    return %c0_i32, %c0_i32_0 : i32, i32
  }
  func.func @transform_2(%arg0: i32) -> (i32, i32) {
    %c0_i32 = arith.constant 0 : i32
    %c0_i32_0 = arith.constant 0 : i32
    %c0_i32_1 = arith.constant 0 : i32
    return %c0_i32, %c0_i32_0 : i32, i32
  }
  func.func @transform_3(%arg0: i32) -> (i32, i32) {
    %c0_i32 = arith.constant 0 : i32
    %c0_i32_0 = arith.constant 0 : i32
    %c0_i32_1 = arith.constant 0 : i32
    return %c0_i32, %c0_i32_0 : i32, i32
  }
  func.func @transform_4(%arg0: i32) -> (i32, i32) {
    %c0_i32 = arith.constant 0 : i32
    %c0_i32_0 = arith.constant 0 : i32
    %c0_i32_1 = arith.constant 0 : i32
    return %c0_i32, %c0_i32_0 : i32, i32
  }
  func.func @transform_5(%arg0: i32) -> (i32, i32) {
    %c0_i32 = arith.constant 0 : i32
    %c0_i32_0 = arith.constant 0 : i32
    %c0_i32_1 = arith.constant 0 : i32
    return %c0_i32, %c0_i32_0 : i32, i32
  }
  func.func @transform_6(%arg0: i32) -> (i32, i32) {
    %c0_i32 = arith.constant 0 : i32
    %c0_i32_0 = arith.constant 0 : i32
    %c0_i32_1 = arith.constant 0 : i32
    return %c0_i32, %c0_i32_0 : i32, i32
  }
  func.func @transform_7(%arg0: i32) -> (i32, i32) {
    %c0_i32 = arith.constant 0 : i32
    %c0_i32_0 = arith.constant 0 : i32
    return %arg0, %c0_i32 : i32, i32
  }
}

</mosaic_0001>

<bundles_post_ra>
// kernel: tpu_custom_call.1
= control target key start
LH: loop header
LB: loop body
LE: loop exit
PB: predicated region body
PF: predicated region fallthrough
CT: control target
= control target key end

     0   :  { %12 = vsyncpa [#allocation3], 0  ;;  %s2747_s0 = inlined_call_operand.vmem [shape: f32[256,32], index: 0, kind: input, shape index: {}]   ;;  %s2748_s1 = inlined_call_operand.vmem [shape: bf16[32,64], index: 1, kind: input, shape index: {}]   ;;  %s2749_s2 = inlined_call_operand.vmem [shape: f32[3,64], index: 2, kind: input, shape index: {}]   ;;  %s2750_s3 = inlined_call_operand.vmem [shape: bf16[64,32], index: 3, kind: input, shape index: {}]   ;;  %s2751_s4 = inlined_call_operand.vmem [shape: f32[3,32], index: 4, kind: input, shape index: {}]   ;;  %s2752_s5 = inlined_call_operand.vmem [shape: bf16[32,128], index: 5, kind: input, shape index: {}]   ;;  %s2753_s6 = inlined_call_operand.vmem [shape: f32[1,128], index: 6, kind: input, shape index: {}]   ;;  %s2754_s7 = inlined_call_operand.hbm [shape: f32[256,128], index: 7, kind: output, shape index: {}]  }
   0x1   :  { %14 = vsyncpa [#allocation3 + $0x1], 0  ;;  %s1959_s24 = smov 0   ;;  %s1961_s25 = smov 0  }
   0x2   :  { %s1963_s26 = smov 0   ;;  %s1965_s27 = smov 0  }
   0x3 LB: > { %s1980_s28 = sadd.s32 4294967295, %s1913_s27   ;;  %s1622_s29 = sadd.s32 4294967294, %s1913_s27   ;;  %s1913_s27 = sphi %s1965_s27, %s2762_s27   ;;  %s1909_s26 = sphi %s1963_s26, %s2761_s26   ;;  %s1905_s25 = sphi %s1961_s25, %s2760_s25   ;;  %s1901_s24 = sphi %s1959_s24, %s2759_s24  }
   0x4   : > { %s1984_s30 = sadd.s32 1, %s1913_s27   ;;  %s179_s8 = sadd.s32 1, %s1909_s26 }
   0x5   : > { %s176_s9 = ssub.s32 %s1913_s27, %s1984_s30  ;;  %p189_p0 = scmp.ne.s32.totalorder %s1909_s26, %s1905_s25 }
   0x6   : > { %p177_p1 = scmp.eq.s32.totalorder %s176_s9, 0  ;;  %p190_p2 = scmp.eq.s32.totalorder %s1980_s28, 1 }
   0x7   : > { %p195_p3 = scmp.ne.s32.totalorder %s1905_s25, %s1901_s24  ;;  %p196_p4 = scmp.eq.s32.totalorder %s1622_s29, 1 }
   0x8   : > { %s1995_s10 = scalar_select %p177_p1, %s1909_s26, %s179_s8  }
   0x9   : > { %p1997_p5 = por %p190_p2, %p189_p0  ;;  %p2001_p6 = por %p196_p4, %p195_p3 }
   0xa   : > { %p1625_p7 = scmp.ge.s32.totalorder %s1913_s27, 1  ;;  %p241_p8 = scmp.lt.s32.totalorder %s1913_s27, 3 }
   0xc   : > { %p242_p9 = pnand %p1625_p7, %p241_p8 }
   0xd   : > { %s1627_s15 = sshll.u32 (!%p242_p9), %s1980_s28, 4  ;;  %s270_s9 = sand.u32 (!%p242_p9), 1, %s1905_s25  }
   0xe   : > { %245 = sbr.rel (%p242_p9) target bundleno = 886 (0x376), region = 48  ;;  %p274_p10 = scmp.lt.s32.totalorder (!%p242_p9), %s1627_s15, 31 }
   0xf   : > { %s1626_s13 = sshll.u32 (!%p242_p9), %s270_s9, 7  ;;  %s1871_s8 = scalar_lea.hbm (!%p242_p9), %s2754_s7, 256 }
  0x10   : > { %s2681_s14 = scalar_lea.vmem (!%p242_p9), [#allocation2], %s1626_s13 }
  0x11   : > { %s1557_s19 = sshll.u32 (!%p242_p9), %s2681_s14, 4  ;;  %s1558_s19 = int_to_ptr.vmem [resolvable:$true] %s1557_s19 }
  0x13   : > { %v1691_v0 = vld [vmem:[%s2748_s1 + $0x8] sm:$0xff]  ;;  %v1690_v1 = vld [vmem:[%s2748_s1] sm:$0xff]  ;;  %s2764_s15 = smov (!%p274_p10, %s1627_s15), 31  ;;  %vm323_vm0 = vcmask 261120   ;;  %vm397_vm1 = vcmask 523264  }
  0x14   : > { %354 = vmatpush.bf16.msra.mxu0 %v1691_v0  ;;  %1699 = vmatpush.bf16.msra.mxu3 %v1691_v0  ;;  %s1628_s18 = sshll.u32 %s2764_s15, 3  ;;  %v2046_v26 = vld [vmem:[%s2749_s2] sm:$0x7]  ;;  %s1698_s15 = sshll.u32 %s1980_s28, 7 }
  0x15   : > { %s2017_s21 = scalar_lea.vmem %s2747_s0, %s1628_s18  ;;  %v2049_v27 = vperm.slane %v2046_v26, 0  ;;  %s1556_s18 = scalar_lea.hbm %s2754_s7, %s1698_s15 }
  0x16   : > { %v281_v2 = vld [vmem:[%s2017_s21] sm:$0xff]  ;;  %v282_v3 = vld [vmem:[%s2017_s21 + $0x8] sm:$0xff]  ;;  %v283_v5 = vld [vmem:[%s2017_s21 + $0x10] sm:$0xff]  ;;  %s1559_s20 = sshll.u32 %s1556_s18, 4  ;;  %s1545_s28 = scalar_lea.sflag [#allocation3], %s270_s9  ;;  %s1560_s20 = int_to_ptr.hbm [resolvable:$true] %s1559_s20 }
  0x17   : > { %v302_v4 = vpack.c.bf16 %v282_v3, %v281_v2  ;;  %v284_v6 = vld [vmem:[%s2017_s21 + $0x18] sm:$0xff]  ;;  %v285_v8 = vld [vmem:[%s2017_s21 + $0x20] sm:$0xff]  ;;  %v286_v9 = vld [vmem:[%s2017_s21 + $0x28] sm:$0xff] }
  0x18   : > { %355 = vmatpush.bf16.msra.mxu0 %v1690_v1  ;;  %1700 = vmatpush.bf16.msra.mxu3 %v1690_v1  ;;  %v303_v7 = vpack.c.bf16 %v284_v6, %v283_v5  ;;  %v304_v10 = vpack.c.bf16 %v286_v9, %v285_v8  ;;  %v287_v11 = vld [vmem:[%s2017_s21 + $0x30] sm:$0xff]  ;;  %v288_v12 = vld [vmem:[%s2017_s21 + $0x38] sm:$0xff]  ;;  %v289_v14 = vld [vmem:[%s2017_s21 + $0x40] sm:$0xff] }
  0x19   : > { %v305_v13 = vpack.c.bf16 %v288_v12, %v287_v11  ;;  %v290_v15 = vld [vmem:[%s2017_s21 + $0x48] sm:$0xff]  ;;  %v295_v17 = vld [vmem:[%s2017_s21 + $0x70] sm:$0xff]  ;;  %v296_v18 = vld [vmem:[%s2017_s21 + $0x78] sm:$0xff] }
  0x1a   : > { %v306_v16 = vpack.c.bf16 %v290_v15, %v289_v14  ;;  %v309_v19 = vpack.c.bf16 %v296_v18, %v295_v17  ;;  %v291_v20 = vld [vmem:[%s2017_s21 + $0x50] sm:$0xff]  ;;  %v292_v21 = vld [vmem:[%s2017_s21 + $0x58] sm:$0xff]  ;;  %v293_v23 = vld [vmem:[%s2017_s21 + $0x60] sm:$0xff] }
  0x1b   : > { %1637 = vmatmul.msk.bf16.vlgmr.msra.gmra.mxu0 %vm323_vm0, %v302_v4  ;;  %v307_v22 = vpack.c.bf16 %v292_v21, %v291_v20  ;;  %v294_v24 = vld [vmem:[%s2017_s21 + $0x68] sm:$0xff]  ;;  %v1915_v20 = vmov 64.0   ;;  %s1865_s21 = sshra.s32 %s1560_s20, 4  ;;  %s1866_s21 = int_to_ptr.hbm [resolvable:$true] %s1865_s21 }
  0x1c   : > { %1644 = vmatmul.msk.bf16.vlgmr.msra.gmra.mxu3 %vm323_vm0, %v309_v19  ;;  %v308_v25 = vpack.c.bf16 %v294_v24, %v293_v23  ;;  %1751 = vrcp.f32 %v1915_v20  ;;  %s1867_s22 = scalar_lea.hbm %s1866_s21, 128  ;;  %p1872_p0 = scmp.lt.s32.totalorder %s1866_s21, %s2754_s7 }
  0x1d   : > { %p1868_p11 = scmp.ne.s32.totalorder %s1866_s21, %s1867_s22  ;;  %p1873_p1 = scmp.lt.s32.totalorder %s1871_s8, %s1867_s22 }
  0x1f   : > { %p1869_p12 = pnand %p1868_p11, %p1997_p5  ;;  %p1874_p2 = por %p1873_p1, %p1872_p0 }
  0x21   : > { %p1870_p13 = pneg %p1869_p12 }
  0x22   : > { %v1752_v24 = vpop.eup %1751 }
  0x23   : > { %vm451_vm2 = vweird.f32 %v1752_v24  ;;  %p1875_p3 = pnand %p1874_p2, %p1870_p13 }
  0x2b   : > { %1638 = vmatmul.msk.bf16.gmra.mxu0 %vm323_vm0, %v303_v7 }
  0x3b   : > { %1639 = vmatmul.msk.bf16.gmra.mxu0 %vm323_vm0, %v304_v10 }
  0x4b   : > { %1640 = vmatmul.msk.bf16.gmra.mxu0 %vm323_vm0, %v305_v13 }
  0x5b   : > { %1641 = vmatmul.msk.bf16.gmra.mxu0 %vm323_vm0, %v306_v16 }
  0x6b   : > { %1642 = vmatmul.msk.bf16.gmra.mxu0 %vm323_vm0, %v307_v22 }
  0x7b   : > { %1643 = vmatmul.msk.bf16.gmra.mxu0 %vm323_vm0, %v308_v25 }
  0x98   : > { %v357_v28 = vpop.f32.mrf.mxu0 }
  0x99   : > { %v2052_v29 = vadd.f32 %v357_v28, %v2049_v27 }
  0x9b   : > { %v398_v30 = vsel %vm397_vm1, %v2052_v29, 0.0  ;;  %v469_v31 = vmul.f32 %v2052_v29, %v2052_v29 }
  0x9c   : > { %399 = vadd.xlane.f32.xlu0 %v398_v30 }
  0x9d   : > { %v485_v32 = vsel %vm397_vm1, %v469_v31, 0.0  ;;  %v447_v31 = vmul.f32 64.0, %v1752_v24 }
  0x9e   : > { %486 = vadd.xlane.f32.xlu1 %v485_v32 }
  0x9f   : > { %v392_v21 = vpop.f32.mrf.mxu3 }
  0xa0   : > { %v359_v33 = vpop.f32.mrf.mxu0  ;;  %v2150_v32 = vadd.f32 %v392_v21, %v2049_v27 }
  0xa1   : > { %v2060_v34 = vadd.f32 %v359_v33, %v2049_v27 }
  0xa3   : > { %v401_v35 = vsel %vm397_vm1, %v2060_v34, 0.0  ;;  %v470_v36 = vmul.f32 %v2060_v34, %v2060_v34 }
  0xa4   : > { %402 = vadd.xlane.f32.xlu0 %v401_v35 }
  0xa5   : > { %v488_v37 = vsel %vm397_vm1, %v470_v36, 0.0 }
  0xa6   : > { %489 = vadd.xlane.f32.xlu1 %v488_v37  ;;  %v448_v37 = vsub.f32 1.0, %v447_v31 }
  0xa7   : > { %v394_v35 = vpop.f32.mrf.mxu3 }
  0xa8   : > { %v362_v38 = vpop.f32.mrf.mxu0 }
  0xa9   : > { %v2068_v39 = vadd.f32 %v362_v38, %v2049_v27 }
  0xab   : > { %v404_v40 = vsel %vm397_vm1, %v2068_v39, 0.0  ;;  %v471_v41 = vmul.f32 %v2068_v39, %v2068_v39 }
  0xac   : > { %405 = vadd.xlane.f32.xlu2 %v404_v40 }
  0xad   : > { %v491_v42 = vsel %vm397_vm1, %v471_v41, 0.0  ;;  %v440_v41 = vsel %vm397_vm1, %v2150_v32, 0.0 }
  0xae   : > { %492 = vadd.xlane.f32.xlu0 %v491_v42  ;;  %v2162_v42 = vadd.f32 %v394_v35, %v2049_v27 }
  0xb0   : > { %v364_v43 = vpop.f32.mrf.mxu0 }
  0xb1   : > { %v2076_v44 = vadd.f32 %v364_v43, %v2049_v27 }
  0xb3   : > { %v407_v45 = vsel %vm397_vm1, %v2076_v44, 0.0  ;;  %v472_v46 = vmul.f32 %v2076_v44, %v2076_v44 }
  0xb4   : > { %408 = vadd.xlane.f32.xlu2 %v407_v45  ;;  %v449_v45 = vmul.f32 %v1752_v24, %v448_v37 }
  0xb5   : > { %v494_v47 = vsel %vm397_vm1, %v472_v46, 0.0 }
  0xb6   : > { %495 = vadd.xlane.f32.xlu1 %v494_v47  ;;  %v484_v47 = vmul.f32 %v2162_v42, %v2162_v42 }
  0xb8   : > { %v367_v48 = vpop.f32.mrf.mxu0 }
  0xb9   : > { %v2084_v49 = vadd.f32 %v367_v48, %v2049_v27 }
  0xbb   : > { %v410_v50 = vsel %vm397_vm1, %v2084_v49, 0.0  ;;  %v473_v51 = vmul.f32 %v2084_v49, %v2084_v49 }
  0xbc   : > { %411 = vadd.xlane.f32.xlu2 %v410_v50  ;;  %v450_v50 = vadd.f32 %v1752_v24, %v449_v45 }
  0xbd   : > { %v497_v52 = vsel %vm397_vm1, %v473_v51, 0.0  ;;  %v530_v51 = vsel %vm397_vm1, %v484_v47, 0.0 }
  0xbe   : > { %498 = vadd.xlane.f32.xlu1 %v497_v52  ;;  %v1695_v52 = vld [vmem:[%s2750_s3 + $0x18] sm:$0xff] }
  0xbf   : > { %909 = vmatpush.bf16.msra.mxu1 %v1695_v52  ;;  %1701 = vmatpush.bf16.msrb.mxu3 %v1695_v52  ;;  %v2211_v52 = vperm.slane %v2046_v26, 1 }
  0xc0   : > { %v369_v53 = vpop.f32.mrf.mxu0 }
  0xc1   : > { %v2092_v54 = vadd.f32 %v369_v53, %v2049_v27 }
  0xc3   : > { %v413_v55 = vsel %vm397_vm1, %v2092_v54, 0.0  ;;  %v474_v56 = vmul.f32 %v2092_v54, %v2092_v54 }
  0xc4   : > { %414 = vadd.xlane.f32.xlu0 %v413_v55  ;;  %v2177_v55 = vsel %vm451_vm2, %v1752_v24, %v450_v50 }
  0xc5   : > { %v500_v57 = vsel %vm397_vm1, %v474_v56, 0.0 }
  0xc6   : > { %501 = vadd.xlane.f32.xlu2 %v500_v57  ;;  %v483_v57 = vmul.f32 %v2150_v32, %v2150_v32 }
  0xc8   : > { %v372_v58 = vpop.f32.mrf.mxu0 }
  0xc9   : > { %v2100_v59 = vadd.f32 %v372_v58, %v2049_v27  ;;  %v1694_v58 = vld [vmem:[%s2750_s3 + $0x10] sm:$0xff] }
  0xca   : > { %910 = vmatpush.bf16.msra.mxu1 %v1694_v58  ;;  %1702 = vmatpush.bf16.msrb.mxu3 %v1694_v58 }
  0xcb   : > { %v416_v60 = vsel %vm397_vm1, %v2100_v59, 0.0  ;;  %v475_v61 = vmul.f32 %v2100_v59, %v2100_v59 }
  0xcc   : > { %417 = vadd.xlane.f32.xlu0 %v416_v60 }
  0xcd   : > { %v503_v62 = vsel %vm397_vm1, %v475_v61, 0.0 }
  0xce   : > { %504 = vadd.xlane.f32.xlu2 %v503_v62 }
  0xd0   : > { %v374_v63 = vpop.f32.mrf.mxu0 }
  0xd1   : > { %v2108_v0 = vadd.f32 %v374_v63, %v2049_v27 }
  0xd3   : > { %v419_v1 = vsel %vm397_vm1, %v2108_v0, 0.0  ;;  %v476_v2 = vmul.f32 %v2108_v0, %v2108_v0 }
  0xd4   : > { %420 = vadd.xlane.f32.xlu1 %v419_v1  ;;  %v527_v1 = vsel %vm397_vm1, %v483_v57, 0.0 }
  0xd5   : > { %v506_v3 = vsel %vm397_vm1, %v476_v2, 0.0  ;;  %v1693_v2 = vld [vmem:[%s2750_s3 + $0x8] sm:$0xff] }
  0xd6   : > { %507 = vadd.xlane.f32.xlu0 %v506_v3  ;;  %911 = vmatpush.bf16.msra.mxu1 %v1693_v2 }
  0xd7   : > { %1703 = vmatpush.bf16.msrb.mxu3 %v1693_v2 }
  0xd8   : > { %v377_v4 = vpop.f32.mrf.mxu0 }
  0xd9   : > { %v2116_v5 = vadd.f32 %v377_v4, %v2049_v27  ;;  %v443_v4 = vsel %vm397_vm1, %v2162_v42, 0.0 }
  0xdb   : > { %v422_v6 = vsel %vm397_vm1, %v2116_v5, 0.0  ;;  %v477_v7 = vmul.f32 %v2116_v5, %v2116_v5 }
  0xdc   : > { %423 = vadd.xlane.f32.xlu1 %v422_v6 }
  0xdd   : > { %v509_v8 = vsel %vm397_vm1, %v477_v7, 0.0 }
  0xde   : > { %510 = vadd.xlane.f32.xlu0 %v509_v8  ;;  %v1692_v8 = vld [vmem:[%s2750_s3] sm:$0xff] }
  0xdf   : > { %912 = vmatpush.bf16.msra.mxu1 %v1692_v8  ;;  %1704 = vmatpush.bf16.msrb.mxu3 %v1692_v8 }
  0xe0   : > { %v379_v9 = vpop.f32.mrf.mxu0 }
  0xe1   : > { %v2124_v10 = vadd.f32 %v379_v9, %v2049_v27 }
  0xe3   : > { %v425_v11 = vsel %vm397_vm1, %v2124_v10, 0.0  ;;  %v478_v12 = vmul.f32 %v2124_v10, %v2124_v10 }
  0xe4   : > { %426 = vadd.xlane.f32.xlu2 %v425_v11 }
  0xe5   : > { %v512_v13 = vsel %vm397_vm1, %v478_v12, 0.0 }
  0xe6   : > { %513 = vadd.xlane.f32.xlu1 %v512_v13 }
  0xe8   : > { %v382_v14 = vpop.f32.mrf.mxu0 }
  0xe9   : > { %v2132_v15 = vadd.f32 %v382_v14, %v2049_v27 }
  0xeb   : > { %v428_v16 = vsel %vm397_vm1, %v2132_v15, 0.0  ;;  %v479_v48 = vmul.f32 %v2132_v15, %v2132_v15 }
  0xec   : > { %429 = vadd.xlane.f32.xlu0 %v428_v16 }
  0xed   : > { %v515_v53 = vsel %vm397_vm1, %v479_v48, 0.0 }
  0xf0   : > { %v384_v17 = vpop.f32.mrf.mxu0 }
  0xf1   : > { %v2137_v18 = vadd.f32 %v384_v17, %v2049_v27 }
  0xf3   : > { %v431_v19 = vsel %vm397_vm1, %v2137_v18, 0.0  ;;  %v480_v46 = vmul.f32 %v2137_v18, %v2137_v18 }
  0xf4   : > { %432 = vadd.xlane.f32.xlu1 %v431_v19 }
  0xf8   : > { %v387_v22 = vpop.f32.mrf.mxu0 }
  0xf9   : > { %v2142_v23 = vadd.f32 %v387_v22, %v2049_v27 }
  0xfb   : > { %v434_v25 = vsel %vm397_vm1, %v2142_v23, 0.0  ;;  %v481_v28 = vmul.f32 %v2142_v23, %v2142_v23 }
  0xfc   : > { %435 = vadd.xlane.f32.xlu2 %v434_v25 }
  0xfd   : > { %v521_v30 = vsel %vm397_vm1, %v481_v28, 0.0 }
  0xfe   : > { %522 = vadd.xlane.f32.xlu1 %v521_v30 }
 0x100   : > { %v389_v33 = vpop.f32.mrf.mxu0 }
 0x101   : > { %v2153_v36 = vadd.f32 %v389_v33, %v2049_v27  ;;  %v518_v27 = vsel %vm397_vm1, %v480_v46, 0.0 }
 0x103   : > { %v437_v38 = vsel %vm397_vm1, %v2153_v36, 0.0  ;;  %v482_v40 = vmul.f32 %v2153_v36, %v2153_v36 }
 0x104   : > { %438 = vadd.xlane.f32.xlu0 %v437_v38 }
 0x105   : > { %v524_v43 = vsel %vm397_vm1, %v482_v40, 0.0 }
 0x106   : > { %525 = vadd.xlane.f32.xlu2 %v524_v43  ;;  %441 = vadd.xlane.f32.xlu1 %v440_v41 }
 0x10c   : > { %519 = vadd.xlane.f32.xlu0 %v518_v27 }
 0x10e   : > { %516 = vadd.xlane.f32.xlu2 %v515_v53  ;;  %531 = vadd.xlane.f32.xlu1 %v530_v51 }
 0x10f   : > { %v400_v56 = vpop.xlane.xlu0 %399 }
 0x110   : > { %v453_v60 = vmul.f32 %v2177_v55, %v400_v56 }
 0x111   : > { %v487_v61 = vpop.xlane.xlu1 %486 }
 0x112   : > { %v549_v62 = vmul.f32 %v453_v60, %v453_v60  ;;  %v533_v63 = vmul.f32 %v487_v61, %v2177_v55  ;;  %v581_v48 = vsub.f32 %v2052_v29, %v453_v60 }
 0x114   : > { %v565_v3 = vsub.f32 %v533_v63, %v549_v62  ;;  %528 = vadd.xlane.f32.xlu0 %v527_v1  ;;  %v2214_v62 = vperm.slane %v2046_v26, 2 }
 0x116   : > { %v597_v6 = vadd.f32 1e-05, %v565_v3  ;;  %444 = vadd.xlane.f32.xlu2 %v443_v4 }
 0x117   : > { %v403_v7 = vpop.xlane.xlu0 %402 }
 0x118   : > { %1753 = vrsqrt.f32 %v597_v6  ;;  %v454_v9 = vmul.f32 %v2177_v55, %v403_v7  ;;  %vm619_vm4 = vweird.f32 %v597_v6 }
 0x119   : > { %v490_v11 = vpop.xlane.xlu1 %489 }
 0x11a   : > { %v550_v12 = vmul.f32 %v454_v9, %v454_v9  ;;  %v534_v13 = vmul.f32 %v490_v11, %v2177_v55  ;;  %v582_v1 = vsub.f32 %v2060_v34, %v454_v9 }
 0x11c   : > { %v566_v14 = vsub.f32 %v534_v13, %v550_v12 }
 0x11e   : > { %v1754_v16 = vpop.eup %1753  ;;  %v598_v17 = vadd.f32 1e-05, %v566_v14 }
 0x11f   : > { %v614_v19 = vmul.f32 %v1754_v16, %v597_v6  ;;  %v406_v20 = vpop.xlane.xlu2 %405  ;;  %vm620_vm3 = vweird.f32 %v1754_v16 }
 0x120   : > { %1755 = vrsqrt.f32 %v598_v17  ;;  %v2198_v21 = vmul.f32 %v2177_v55, %v406_v20  ;;  %vm621_vm5 = vmor %vm619_vm4, %vm620_vm3  ;;  %vm629_vm7 = vweird.f32 %v598_v17 }
 0x121   : > { %v615_v22 = vmul.f32 %v1754_v16, %v614_v19  ;;  %v493_v24 = vpop.xlane.xlu0 %492 }
 0x122   : > { %v551_v25 = vmul.f32 %v2198_v21, %v2198_v21  ;;  %v535_v28 = vmul.f32 %v493_v24, %v2177_v55 }
 0x123   : > { %v616_v30 = vmul.f32 0.5, %v615_v22 }
 0x124   : > { %v567_v31 = vsub.f32 %v535_v28, %v551_v25 }
 0x125   : > { %v617_v33 = vsub.f32 1.5, %v616_v30 }
 0x126   : > { %v1756_v35 = vpop.eup %1755  ;;  %v599_v37 = vadd.f32 1e-05, %v567_v31 }
 0x127   : > { %v618_v38 = vmul.f32 %v1754_v16, %v617_v33  ;;  %v624_v40 = vmul.f32 %v1756_v35, %v598_v17  ;;  %v409_v41 = vpop.xlane.xlu2 %408  ;;  %vm630_vm6 = vweird.f32 %v1756_v35 }
 0x128   : > { %1757 = vrsqrt.f32 %v599_v37  ;;  %v2204_v43 = vmul.f32 %v2177_v55, %v409_v41  ;;  %vm631_vm8 = vmor %vm629_vm7, %vm630_vm6  ;;  %vm639_vm10 = vweird.f32 %v599_v37 }
 0x129   : > { %v622_v45 = vsel %vm621_vm5, %v1754_v16, %v618_v38  ;;  %v625_v46 = vmul.f32 %v1756_v35, %v624_v40  ;;  %v496_v47 = vpop.xlane.xlu1 %495  ;;  %v583_v38 = vsub.f32 %v2068_v39, %v2198_v21 }
 0x12a   : > { %v552_v50 = vmul.f32 %v2204_v43, %v2204_v43  ;;  %v536_v27 = vmul.f32 %v496_v47, %v2177_v55  ;;  %v773_v56 = vmul.f32 %v622_v45, %v581_v48  ;;  %v584_v39 = vsub.f32 %v2076_v44, %v2204_v43 }
 0x12b   : > { %v626_v51 = vmul.f32 0.5, %v625_v46 }
 0x12c   : > { %v568_v53 = vsub.f32 %v536_v27, %v552_v50  ;;  %v790_v3 = vmul.f32 %v2211_v52, %v773_v56 }
 0x12d   : > { %v627_v57 = vsub.f32 1.5, %v626_v51 }
 0x12e   : > { %v1758_v58 = vpop.eup %1757  ;;  %v600_v61 = vadd.f32 1e-05, %v568_v53  ;;  %v807_v9 = vadd.f32 %v2214_v62, %v790_v3 }
 0x12f   : > { %v628_v63 = vmul.f32 %v1756_v35, %v627_v57  ;;  %v634_v29 = vmul.f32 %v1758_v58, %v599_v37  ;;  %v412_v60 = vpop.xlane.xlu2 %411  ;;  %vm640_vm9 = vweird.f32 %v1758_v58 }
 0x130   : > { %1759 = vrsqrt.f32 %v600_v61  ;;  %v2218_v2 = vmul.f32 %v2177_v55, %v412_v60  ;;  %vm641_vm11 = vmor %vm639_vm10, %vm640_vm9  ;;  %v823_v28 = vmax.f32 %v807_v9, 0.0  ;;  %vm649_vm13 = vweird.f32 %v600_v61 }
 0x131   : > { %v632_v4 = vsel %vm631_vm8, %v1756_v35, %v628_v63  ;;  %v635_v6 = vmul.f32 %v1758_v58, %v634_v29  ;;  %v499_v7 = vpop.xlane.xlu1 %498 }
 0x132   : > { %v553_v26 = vmul.f32 %v2218_v2, %v2218_v2  ;;  %v537_v8 = vmul.f32 %v499_v7, %v2177_v55  ;;  %v774_v11 = vmul.f32 %v632_v4, %v582_v1 }
 0x133   : > { %v636_v12 = vmul.f32 0.5, %v635_v6 }
 0x134   : > { %v569_v13 = vsub.f32 %v537_v8, %v553_v26  ;;  %v791_v34 = vmul.f32 %v2211_v52, %v774_v11 }
 0x135   : > { %v637_v14 = vsub.f32 1.5, %v636_v12 }
 0x136   : > { %v1760_v16 = vpop.eup %1759  ;;  %v601_v17 = vadd.f32 1e-05, %v569_v13  ;;  %v808_v19 = vadd.f32 %v2214_v62, %v791_v34 }
 0x137   : > { %v638_v20 = vmul.f32 %v1758_v58, %v637_v14  ;;  %v644_v22 = vmul.f32 %v1760_v16, %v600_v61  ;;  %v415_v24 = vpop.xlane.xlu0 %414  ;;  %vm650_vm12 = vweird.f32 %v1760_v16 }
 0x138   : > { %1761 = vrsqrt.f32 %v601_v17  ;;  %v2228_v25 = vmul.f32 %v2177_v55, %v415_v24  ;;  %v824_v30 = vmax.f32 %v808_v19, 0.0  ;;  %vm651_vm14 = vmor %vm649_vm13, %vm650_vm12  ;;  %vm659_vm2 = vweird.f32 %v601_v17 }
 0x139   : > { %v642_v31 = vsel %vm641_vm11, %v1758_v58, %v638_v20  ;;  %v645_v33 = vmul.f32 %v1760_v16, %v644_v22  ;;  %v502_v35 = vpop.xlane.xlu2 %501  ;;  %v585_v22 = vsub.f32 %v2084_v49, %v2218_v2 }
 0x13a   : > { %v554_v40 = vmul.f32 %v2228_v25, %v2228_v25  ;;  %v538_v37 = vmul.f32 %v502_v35, %v2177_v55  ;;  %v848_v41 = vpack.c.bf16 %v824_v30, %v823_v28  ;;  %v775_v47 = vmul.f32 %v642_v31, %v583_v38 }
 0x13b   : > { %v646_v45 = vmul.f32 0.5, %v645_v33  ;;  %v586_v49 = vsub.f32 %v2092_v54, %v2228_v25 }
 0x13c   : > { %v570_v46 = vsub.f32 %v538_v37, %v554_v40  ;;  %1661 = vmatmul.msk.bf16.vlgmr.msra.gmra.mxu1 %vm397_vm1, %v848_v41  ;;  %v792_v57 = vmul.f32 %v2211_v52, %v775_v47 }
 0x13d   : > { %v647_v48 = vsub.f32 1.5, %v646_v45 }
 0x13e   : > { %v1762_v50 = vpop.eup %1761  ;;  %v602_v27 = vadd.f32 1e-05, %v570_v46  ;;  %v809_v43 = vadd.f32 %v2214_v62, %v792_v57 }
 0x13f   : > { %v648_v51 = vmul.f32 %v1760_v16, %v647_v48  ;;  %v654_v53 = vmul.f32 %v1762_v50, %v601_v17  ;;  %v418_v56 = vpop.xlane.xlu0 %417  ;;  %vm660_vm15 = vweird.f32 %v1762_v50 }
 0x140   : > { %1763 = vrsqrt.f32 %v602_v27  ;;  %v2239_v21 = vmul.f32 %v2177_v55, %v418_v56  ;;  %vm661_vm3 = vmor %vm659_vm2, %vm660_vm15  ;;  %v825_v9 = vmax.f32 %v809_v43, 0.0  ;;  %vm669_vm5 = vweird.f32 %v602_v27 }
 0x141   : > { %v652_v58 = vsel %vm651_vm14, %v1760_v16, %v648_v51  ;;  %v655_v63 = vmul.f32 %v1762_v50, %v654_v53  ;;  %v505_v29 = vpop.xlane.xlu2 %504 }
 0x142   : > { %v555_v60 = vmul.f32 %v2239_v21, %v2239_v21  ;;  %v539_v61 = vmul.f32 %v505_v29, %v2177_v55  ;;  %v776_v1 = vmul.f32 %v652_v58, %v584_v39 }
 0x143   : > { %v656_v3 = vmul.f32 0.5, %v655_v63 }
 0x144   : > { %v571_v4 = vsub.f32 %v539_v61, %v555_v60  ;;  %v793_v44 = vmul.f32 %v2211_v52, %v776_v1 }
 0x145   : > { %v657_v6 = vsub.f32 1.5, %v656_v3 }
 0x146   : > { %v1764_v7 = vpop.eup %1763  ;;  %v603_v26 = vadd.f32 1e-05, %v571_v4  ;;  %v810_v8 = vadd.f32 %v2214_v62, %v793_v44 }
 0x147   : > { %v658_v11 = vmul.f32 %v1762_v50, %v657_v6  ;;  %v664_v12 = vmul.f32 %v1764_v7, %v602_v27  ;;  %v421_v13 = vpop.xlane.xlu1 %420  ;;  %vm670_vm4 = vweird.f32 %v1764_v7 }
 0x148   : > { %1765 = vrsqrt.f32 %v603_v26  ;;  %v2249_v34 = vmul.f32 %v2177_v55, %v421_v13  ;;  %v826_v14 = vmax.f32 %v810_v8, 0.0  ;;  %vm671_vm6 = vmor %vm669_vm5, %vm670_vm4  ;;  %vm679_vm8 = vweird.f32 %v603_v26 }
 0x149   : > { %v662_v16 = vsel %vm661_vm3, %v1762_v50, %v658_v11  ;;  %v665_v19 = vmul.f32 %v1764_v7, %v664_v12  ;;  %v508_v20 = vpop.xlane.xlu0 %507  ;;  %v587_v8 = vsub.f32 %v2100_v59, %v2239_v21 }
 0x14a   : > { %v556_v24 = vmul.f32 %v2249_v34, %v2249_v34  ;;  %v540_v17 = vmul.f32 %v508_v20, %v2177_v55  ;;  %v849_v28 = vpack.c.bf16 %v826_v14, %v825_v9  ;;  %v777_v33 = vmul.f32 %v662_v16, %v585_v22 }
 0x14b   : > { %v666_v30 = vmul.f32 0.5, %v665_v19  ;;  %v588_v59 = vsub.f32 %v2108_v0, %v2249_v34 }
 0x14c   : > { %v572_v31 = vsub.f32 %v540_v17, %v556_v24  ;;  %1662 = vmatmul.msk.bf16.gmra.mxu1 %vm397_vm1, %v849_v28  ;;  %v794_v46 = vmul.f32 %v2211_v52, %v777_v33 }
 0x14d   : > { %v667_v35 = vsub.f32 1.5, %v666_v30 }
 0x14e   : > { %v1766_v38 = vpop.eup %1765  ;;  %v604_v40 = vadd.f32 1e-05, %v572_v31  ;;  %v811_v25 = vadd.f32 %v2214_v62, %v794_v46 }
 0x14f   : > { %v668_v37 = vmul.f32 %v1764_v7, %v667_v35  ;;  %v674_v41 = vmul.f32 %v1766_v38, %v603_v26  ;;  %v424_v45 = vpop.xlane.xlu1 %423  ;;  %vm680_vm7 = vweird.f32 %v1766_v38 }
 0x150   : > { %1767 = vrsqrt.f32 %v604_v40  ;;  %v2260_v2 = vmul.f32 %v2177_v55, %v424_v45  ;;  %vm681_vm9 = vmor %vm679_vm8, %vm680_vm7  ;;  %v827_v4 = vmax.f32 %v811_v25, 0.0  ;;  %vm689_vm11 = vweird.f32 %v604_v40 }
 0x151   : > { %v672_v47 = vsel %vm671_vm6, %v1764_v7, %v668_v37  ;;  %v675_v48 = vmul.f32 %v1766_v38, %v674_v41  ;;  %v511_v50 = vpop.xlane.xlu0 %510 }
 0x152   : > { %v557_v51 = vmul.f32 %v2260_v2, %v2260_v2  ;;  %v541_v27 = vmul.f32 %v511_v50, %v2177_v55  ;;  %v778_v53 = vmul.f32 %v672_v47, %v586_v49  ;;  %v589_v50 = vsub.f32 %v2116_v5, %v2260_v2 }
 0x153   : > { %v676_v56 = vmul.f32 0.5, %v675_v48 }
 0x154   : > { %v573_v39 = vsub.f32 %v541_v27, %v557_v51  ;;  %v795_v54 = vmul.f32 %v2211_v52, %v778_v53 }
 0x155   : > { %v677_v57 = vsub.f32 1.5, %v676_v56 }
 0x156   : > { %v1768_v58 = vpop.eup %1767  ;;  %v605_v63 = vadd.f32 1e-05, %v573_v39  ;;  %v812_v29 = vadd.f32 %v2214_v62, %v795_v54 }
 0x157   : > { %v678_v60 = vmul.f32 %v1766_v38, %v677_v57  ;;  %v684_v61 = vmul.f32 %v1768_v58, %v604_v40  ;;  %v427_v1 = vpop.xlane.xlu2 %426  ;;  %vm690_vm10 = vweird.f32 %v1768_v58 }
 0x158   : > { %1769 = vrsqrt.f32 %v605_v63  ;;  %v2270_v3 = vmul.f32 %v2177_v55, %v427_v1  ;;  %v828_v44 = vmax.f32 %v812_v29, 0.0  ;;  %vm691_vm12 = vmor %vm689_vm11, %vm690_vm10  ;;  %vm699_vm14 = vweird.f32 %v605_v63 }
 0x159   : > { %v682_v43 = vsel %vm681_vm9, %v1766_v38, %v678_v60  ;;  %v685_v6 = vmul.f32 %v1768_v58, %v684_v61  ;;  %v514_v7 = vpop.xlane.xlu1 %513 }
 0x15a   : > { %v558_v11 = vmul.f32 %v2270_v3, %v2270_v3  ;;  %v542_v26 = vmul.f32 %v514_v7, %v2177_v55  ;;  %v850_v12 = vpack.c.bf16 %v828_v44, %v827_v4  ;;  %v779_v14 = vmul.f32 %v682_v43, %v587_v8 }
 0x15b   : > { %v686_v13 = vmul.f32 0.5, %v685_v6  ;;  %v590_v25 = vsub.f32 %v2124_v10, %v2270_v3 }
 0x15c   : > { %v574_v9 = vsub.f32 %v542_v26, %v558_v11  ;;  %1663 = vmatmul.msk.bf16.gmra.mxu1 %vm397_vm1, %v850_v12  ;;  %v796_v21 = vmul.f32 %v2211_v52, %v779_v14 }
 0x15d   : > { %v687_v16 = vsub.f32 1.5, %v686_v13 }
 0x15e   : > { %v1770_v19 = vpop.eup %1769  ;;  %v606_v20 = vadd.f32 1e-05, %v574_v9  ;;  %v813_v35 = vadd.f32 %v2214_v62, %v796_v21 }
 0x15f   : > { %v688_v22 = vmul.f32 %v1768_v58, %v687_v16  ;;  %v694_v24 = vmul.f32 %v1770_v19, %v605_v63  ;;  %vm700_vm13 = vweird.f32 %v1770_v19  ;;  %v430_v39 = vpop.xlane.xlu0 %429 }
 0x160   : > { %1771 = vrsqrt.f32 %v606_v20  ;;  %v829_v0 = vmax.f32 %v813_v35, 0.0  ;;  %vm701_vm15 = vmor %vm699_vm14, %vm700_vm13  ;;  %vm709_vm3 = vweird.f32 %v606_v20  ;;  %v2310_v16 = vmul.f32 %v2177_v55, %v430_v39 }
 0x161   : > { %v692_v17 = vsel %vm691_vm12, %v1768_v58, %v688_v22  ;;  %v695_v28 = vmul.f32 %v1770_v19, %v694_v24 }
 0x162   : > { %v780_v30 = vmul.f32 %v692_v17, %v588_v59 }
 0x163   : > { %v696_v31 = vmul.f32 0.5, %v695_v28 }
 0x164   : > { %v797_v33 = vmul.f32 %v2211_v52, %v780_v30  ;;  %v559_v30 = vmul.f32 %v2310_v16, %v2310_v16 }
 0x165   : > { %v697_v38 = vsub.f32 1.5, %v696_v31 }
 0x166   : > { %v1772_v37 = vpop.eup %1771  ;;  %v814_v40 = vadd.f32 %v2214_v62, %v797_v33 }
 0x167   : > { %v698_v41 = vmul.f32 %v1770_v19, %v697_v38  ;;  %v704_v45 = vmul.f32 %v1772_v37, %v606_v20  ;;  %v433_v46 = vpop.xlane.xlu1 %432  ;;  %vm710_vm2 = vweird.f32 %v1772_v37 }
 0x168   : > { %v830_v34 = vmax.f32 %v814_v40, 0.0  ;;  %vm711_vm4 = vmor %vm709_vm3, %vm710_vm2  ;;  %v2306_v13 = vmul.f32 %v2177_v55, %v433_v46 }
 0x169   : > { %v705_v49 = vmul.f32 %v1772_v37, %v704_v45  ;;  %v702_v47 = vsel %vm701_vm15, %v1770_v19, %v698_v41 }
 0x16a   : > { %v851_v48 = vpack.c.bf16 %v830_v34, %v829_v0  ;;  %v781_v53 = vmul.f32 %v702_v47, %v589_v50  ;;  %v560_v24 = vmul.f32 %v2306_v13, %v2306_v13 }
 0x16b   : > { %v706_v51 = vmul.f32 0.5, %v705_v49 }
 0x16c   : > { %1664 = vmatmul.msk.bf16.gmra.mxu1 %vm397_vm1, %v851_v48  ;;  %v798_v5 = vmul.f32 %v2211_v52, %v781_v53 }
 0x16d   : > { %v707_v27 = vsub.f32 1.5, %v706_v51 }
 0x16e   : > { %v815_v4 = vadd.f32 %v2214_v62, %v798_v5 }
 0x16f   : > { %v708_v56 = vmul.f32 %v1772_v37, %v707_v27  ;;  %v436_v54 = vpop.xlane.xlu2 %435 }
 0x170   : > { %v2290_v57 = vmul.f32 %v2177_v55, %v436_v54  ;;  %v831_v8 = vmax.f32 %v815_v4, 0.0 }
 0x171   : > { %v712_v58 = vsel %vm711_vm4, %v1772_v37, %v708_v56  ;;  %v523_v63 = vpop.xlane.xlu1 %522 }
 0x172   : > { %v561_v2 = vmul.f32 %v2290_v57, %v2290_v57  ;;  %v545_v29 = vmul.f32 %v523_v63, %v2177_v55  ;;  %v782_v60 = vmul.f32 %v712_v58, %v590_v25  ;;  %v593_v56 = vsub.f32 %v2142_v23, %v2290_v57 }
 0x174   : > { %v577_v61 = vsub.f32 %v545_v29, %v561_v2  ;;  %v799_v1 = vmul.f32 %v2211_v52, %v782_v60 }
 0x176   : > { %v609_v10 = vadd.f32 1e-05, %v577_v61  ;;  %v816_v3 = vadd.f32 %v2214_v62, %v799_v1 }
 0x177   : > { %v439_v44 = vpop.xlane.xlu0 %438 }
 0x178   : > { %1773 = vrsqrt.f32 %v609_v10  ;;  %v2300_v43 = vmul.f32 %v2177_v55, %v439_v44  ;;  %v832_v6 = vmax.f32 %v816_v3, 0.0  ;;  %vm739_vm6 = vweird.f32 %v609_v10 }
 0x179   : > { %v526_v7 = vpop.xlane.xlu2 %525  ;;  %v442_v17 = vpop.xlane.xlu1 %441 }
 0x17a   : > { %v562_v11 = vmul.f32 %v2300_v43, %v2300_v43  ;;  %v546_v26 = vmul.f32 %v526_v7, %v2177_v55  ;;  %v852_v12 = vpack.c.bf16 %v832_v6, %v831_v8  ;;  %v2319_v45 = vmul.f32 %v2177_v55, %v442_v17 }
 0x17b   : > { %v594_v3 = vsub.f32 %v2153_v36, %v2300_v43 }
 0x17c   : > { %v578_v9 = vsub.f32 %v546_v26, %v562_v11  ;;  %1665 = vmatmul.msk.bf16.gmra.mxu1 %vm397_vm1, %v852_v12  ;;  %v563_v47 = vmul.f32 %v2319_v45, %v2319_v45 }
 0x17e   : > { %v1774_v14 = vpop.eup %1773  ;;  %v610_v19 = vadd.f32 1e-05, %v578_v9 }
 0x17f   : > { %v734_v20 = vmul.f32 %v1774_v14, %v609_v10  ;;  %v520_v22 = vpop.xlane.xlu0 %519  ;;  %vm740_vm5 = vweird.f32 %v1774_v14 }
 0x180   : > { %1775 = vrsqrt.f32 %v610_v19  ;;  %v544_v59 = vmul.f32 %v520_v22, %v2177_v55  ;;  %vm741_vm7 = vmor %vm739_vm6, %vm740_vm5  ;;  %vm749_vm9 = vweird.f32 %v610_v19  ;;  %v592_v22 = vsub.f32 %v2137_v18, %v2306_v13 }
 0x181   : > { %v735_v21 = vmul.f32 %v1774_v14, %v734_v20  ;;  %v517_v28 = vpop.xlane.xlu2 %516  ;;  %v532_v27 = vpop.xlane.xlu1 %531 }
 0x182   : > { %v576_v31 = vsub.f32 %v544_v59, %v560_v24  ;;  %v543_v33 = vmul.f32 %v517_v28, %v2177_v55  ;;  %v548_v5 = vmul.f32 %v532_v27, %v2177_v55 }
 0x183   : > { %v736_v35 = vmul.f32 0.5, %v735_v21 }
 0x184   : > { %v608_v38 = vadd.f32 1e-05, %v576_v31  ;;  %v575_v37 = vsub.f32 %v543_v33, %v559_v30  ;;  %v591_v30 = vsub.f32 %v2132_v15, %v2310_v16 }
 0x185   : > { %v737_v40 = vsub.f32 1.5, %v736_v35 }
 0x186   : > { %v1776_v41 = vpop.eup %1775  ;;  %1777 = vrsqrt.f32 %v608_v38  ;;  %v607_v0 = vadd.f32 1e-05, %v575_v37  ;;  %vm729_vm12 = vweird.f32 %v608_v38 }
 0x187   : > { %v738_v34 = vmul.f32 %v1774_v14, %v737_v40  ;;  %v744_v49 = vmul.f32 %v1776_v41, %v610_v19  ;;  %v529_v46 = vpop.xlane.xlu0 %528  ;;  %vm750_vm8 = vweird.f32 %v1776_v41 }
 0x188   : > { %1779 = vrsqrt.f32 %v607_v0  ;;  %v547_v48 = vmul.f32 %v529_v46, %v2177_v55  ;;  %vm751_vm10 = vmor %vm749_vm9, %vm750_vm8  ;;  %vm719_vm15 = vweird.f32 %v607_v0 }
 0x189   : > { %v742_v50 = vsel %vm741_vm7, %v1774_v14, %v738_v34  ;;  %v745_v51 = vmul.f32 %v1776_v41, %v744_v49  ;;  %v445_v53 = vpop.xlane.xlu2 %444 }
 0x18a   : > { %v579_v39 = vsub.f32 %v547_v48, %v563_v47  ;;  %v2327_v54 = vmul.f32 %v2177_v55, %v445_v53  ;;  %v785_v63 = vmul.f32 %v742_v50, %v593_v56  ;;  %v595_v47 = vsub.f32 %v2150_v32, %v2319_v45 }
 0x18b   : > { %v746_v25 = vmul.f32 0.5, %v745_v51 }
 0x18c   : > { %v1778_v58 = vpop.eup %1777  ;;  %v611_v2 = vadd.f32 1e-05, %v579_v39  ;;  %v564_v29 = vmul.f32 %v2327_v54, %v2327_v54  ;;  %v802_v55 = vmul.f32 %v2211_v52, %v785_v63 }
 0x18d   : > { %v747_v60 = vsub.f32 1.5, %v746_v25  ;;  %v724_v61 = vmul.f32 %v1778_v58, %v608_v38  ;;  %vm730_vm11 = vweird.f32 %v1778_v58  ;;  %v596_v25 = vsub.f32 %v2162_v42, %v2327_v54  ;;  %v2360_v42 = vld [vmem:[%s2751_s4] sm:$0x7] }
 0x18e   : > { %v1780_v1 = vpop.eup %1779  ;;  %1781 = vrsqrt.f32 %v611_v2  ;;  %v580_v4 = vsub.f32 %v548_v5, %v564_v29  ;;  %v819_v19 = vadd.f32 %v2214_v62, %v802_v55  ;;  %vm731_vm14 = vmor %vm729_vm12, %vm730_vm11  ;;  %vm759_vm4 = vweird.f32 %v611_v2 }
 0x18f   : > { %v748_v23 = vmul.f32 %v1776_v41, %v747_v60  ;;  %v725_v57 = vmul.f32 %v1778_v58, %v724_v61  ;;  %v714_v10 = vmul.f32 %v1780_v1, %v607_v0  ;;  %vm720_vm13 = vweird.f32 %v1780_v1 }
 0x190   : > { %v612_v44 = vadd.f32 1e-05, %v580_v4  ;;  %vm721_vm2 = vmor %vm719_vm15, %vm720_vm13  ;;  %v835_v31 = vmax.f32 %v819_v19, 0.0  ;;  %v2363_v54 = vperm.slane %v2360_v42, 0 }
 0x191   : > { %v752_v6 = vsel %vm751_vm10, %v1776_v41, %v748_v23  ;;  %v726_v7 = vmul.f32 0.5, %v725_v57  ;;  %v715_v8 = vmul.f32 %v1780_v1, %v714_v10 }
 0x192   : > { %v786_v11 = vmul.f32 %v752_v6, %v594_v3  ;;  %1783 = vrsqrt.f32 %v612_v44  ;;  %vm769_vm7 = vweird.f32 %v612_v44 }
 0x193   : > { %v727_v26 = vsub.f32 1.5, %v726_v7  ;;  %v716_v12 = vmul.f32 0.5, %v715_v8 }
 0x194   : > { %v1782_v9 = vpop.eup %1781  ;;  %v803_v14 = vmul.f32 %v2211_v52, %v786_v11 }
 0x195   : > { %v728_v20 = vmul.f32 %v1778_v58, %v727_v26  ;;  %v717_v36 = vsub.f32 1.5, %v716_v12  ;;  %v754_v43 = vmul.f32 %v1782_v9, %v611_v2  ;;  %vm760_vm3 = vweird.f32 %v1782_v9 }
 0x196   : > { %v820_v24 = vadd.f32 %v2214_v62, %v803_v14  ;;  %vm761_vm5 = vmor %vm759_vm4, %vm760_vm3 }
 0x197   : > { %v732_v59 = vsel %vm731_vm14, %v1778_v58, %v728_v20  ;;  %v718_v21 = vmul.f32 %v1780_v1, %v717_v36  ;;  %v755_v17 = vmul.f32 %v1782_v9, %v754_v43 }
 0x198   : > { %v1784_v28 = vpop.eup %1783  ;;  %v836_v33 = vmax.f32 %v820_v24, 0.0  ;;  %v784_v35 = vmul.f32 %v732_v59, %v592_v22 }
 0x199   : > { %v722_v38 = vsel %vm721_vm2, %v1780_v1, %v718_v21  ;;  %v756_v37 = vmul.f32 0.5, %v755_v17  ;;  %v764_v40 = vmul.f32 %v1784_v28, %v612_v44  ;;  %vm770_vm6 = vweird.f32 %v1784_v28 }
 0x19a   : > { %v854_v41 = vpack.c.bf16 %v836_v33, %v835_v31  ;;  %v783_v18 = vmul.f32 %v722_v38, %v591_v30  ;;  %v801_v13 = vmul.f32 %v2211_v52, %v784_v35  ;;  %vm771_vm8 = vmor %vm769_vm7, %vm770_vm6 }
 0x19b   : > { %v757_v34 = vsub.f32 1.5, %v756_v37  ;;  %v765_v49 = vmul.f32 %v1784_v28, %v764_v40 }
 0x19c   : > { %1667 = vmatmul.msk.bf16.vlgmr.msrb.gmra.mxu3 %vm397_vm1, %v854_v41  ;;  %v800_v0 = vmul.f32 %v2211_v52, %v783_v18  ;;  %v818_v15 = vadd.f32 %v2214_v62, %v801_v13 }
 0x19d   : > { %v758_v16 = vmul.f32 %v1782_v9, %v757_v34  ;;  %v766_v46 = vmul.f32 0.5, %v765_v49 }
 0x19e   : > { %v817_v48 = vadd.f32 %v2214_v62, %v800_v0  ;;  %v834_v53 = vmax.f32 %v818_v15, 0.0 }
 0x19f   : > { %v762_v50 = vsel %vm761_vm5, %v1782_v9, %v758_v16  ;;  %v767_v51 = vsub.f32 1.5, %v766_v46 }
 0x1a0   : > { %v833_v27 = vmax.f32 %v817_v48, 0.0  ;;  %v787_v56 = vmul.f32 %v762_v50, %v595_v47 }
 0x1a1   : > { %v768_v39 = vmul.f32 %v1784_v28, %v767_v51 }
 0x1a2   : > { %v853_v58 = vpack.c.bf16 %v834_v53, %v833_v27  ;;  %v804_v63 = vmul.f32 %v2211_v52, %v787_v56 }
 0x1a3   : > { %v772_v5 = vsel %vm771_vm8, %v1784_v28, %v768_v39  ;;  %v1916_v39 = vmov 32.0  }
 0x1a4   : > { %v788_v32 = vmul.f32 %v772_v5, %v596_v25  ;;  %1666 = vmatmul.msk.bf16.gmra.mxu1 %vm397_vm1, %v853_v58  ;;  %v821_v2 = vadd.f32 %v2214_v62, %v804_v63  ;;  %1785 = vrcp.f32 %v1916_v39 }
 0x1a6   : > { %v805_v45 = vmul.f32 %v2211_v52, %v788_v32  ;;  %v837_v60 = vmax.f32 %v821_v2, 0.0 }
 0x1a8   : > { %v822_v29 = vadd.f32 %v2214_v62, %v805_v45 }
 0x1aa   : > { %v838_v61 = vmax.f32 %v822_v29, 0.0  ;;  %v1786_v25 = vpop.eup %1785 }
 0x1ab   : > { %v1003_v58 = vmul.f32 32.0, %v1786_v25 }
 0x1ac   : > { %v855_v1 = vpack.c.bf16 %v838_v61, %v837_v60 }
 0x1ad   : > { %v1004_v45 = vsub.f32 1.0, %v1003_v58 }
 0x1ae   : > { %1668 = vmatmul.msk.bf16.gmra.mxu3 %vm397_vm1, %v855_v1  ;;  %vm1007_vm1 = vweird.f32 %v1786_v25 }
 0x1af   : > { %v1005_v1 = vmul.f32 %v1786_v25, %v1004_v45 }
 0x1b9   : > { %v914_v4 = vpop.f32.mrf.mxu1 }
 0x1ba   : > { %v2366_v52 = vadd.f32 %v914_v4, %v2363_v54 }
 0x1bc   : > { %v954_v62 = vsel %vm323_vm0, %v2366_v52, 0.0  ;;  %v1025_v23 = vmul.f32 %v2366_v52, %v2366_v52 }
 0x1bd   : > { %955 = vadd.xlane.f32.xlu2 %v954_v62 }
 0x1be   : > { %v1041_v57 = vsel %vm323_vm0, %v1025_v23, 0.0 }
 0x1bf   : > { %1042 = vadd.xlane.f32.xlu1 %v1041_v57 }
 0x1c1   : > { %v916_v10 = vpop.f32.mrf.mxu1 }
 0x1c2   : > { %v2374_v3 = vadd.f32 %v916_v10, %v2363_v54  ;;  %v1006_v10 = vadd.f32 %v1786_v25, %v1005_v1 }
 0x1c4   : > { %v957_v44 = vsel %vm323_vm0, %v2374_v3, 0.0  ;;  %v1026_v55 = vmul.f32 %v2374_v3, %v2374_v3 }
 0x1c5   : > { %958 = vadd.xlane.f32.xlu0 %v957_v44 }
 0x1c6   : > { %v1044_v6 = vsel %vm323_vm0, %v1026_v55, 0.0 }
 0x1c7   : > { %1045 = vadd.xlane.f32.xlu2 %v1044_v6 }
 0x1c9   : > { %v919_v7 = vpop.f32.mrf.mxu1 }
 0x1ca   : > { %v2382_v8 = vadd.f32 %v919_v7, %v2363_v54 }
 0x1cc   : > { %v960_v11 = vsel %vm323_vm0, %v2382_v8, 0.0  ;;  %v1027_v26 = vmul.f32 %v2382_v8, %v2382_v8 }
 0x1cd   : > { %961 = vadd.xlane.f32.xlu0 %v960_v11  ;;  %v2467_v11 = vsel %vm1007_vm1, %v1786_v25, %v1006_v10 }
 0x1ce   : > { %v1047_v12 = vsel %vm323_vm0, %v1027_v26, 0.0 }
 0x1cf   : > { %1048 = vadd.xlane.f32.xlu2 %v1047_v12 }
 0x1d1   : > { %v921_v9 = vpop.f32.mrf.mxu1 }
 0x1d2   : > { %v2390_v14 = vadd.f32 %v921_v9, %v2363_v54 }
 0x1d4   : > { %v963_v19 = vsel %vm323_vm0, %v2390_v14, 0.0  ;;  %v1028_v20 = vmul.f32 %v2390_v14, %v2390_v14 }
 0x1d5   : > { %964 = vadd.xlane.f32.xlu1 %v963_v19 }
 0x1d6   : > { %v1050_v36 = vsel %vm323_vm0, %v1028_v20, 0.0 }
 0x1d7   : > { %1051 = vadd.xlane.f32.xlu0 %v1050_v36 }
 0x1d9   : > { %v924_v43 = vpop.f32.mrf.mxu1 }
 0x1da   : > { %v2398_v22 = vadd.f32 %v924_v43, %v2363_v54 }
 0x1dc   : > { %v966_v24 = vsel %vm323_vm0, %v2398_v22, 0.0  ;;  %v1029_v59 = vmul.f32 %v2398_v22, %v2398_v22 }
 0x1dd   : > { %967 = vadd.xlane.f32.xlu1 %v966_v24 }
 0x1de   : > { %v1053_v21 = vsel %vm323_vm0, %v1029_v59, 0.0 }
 0x1df   : > { %1054 = vadd.xlane.f32.xlu0 %v1053_v21 }
 0x1e1   : > { %v926_v17 = vpop.f32.mrf.mxu1 }
 0x1e2   : > { %v2406_v28 = vadd.f32 %v926_v17, %v2363_v54  ;;  %v1697_v17 = vld [vmem:[%s2752_s5 + $0x8] sm:$0xff] }
 0x1e3   : > { %1453 = vmatpush.bf16.msra.mxu2 %v1697_v17  ;;  %1705 = vmatpush.bf16.msra.mxu3 %v1697_v17 }
 0x1e4   : > { %v969_v30 = vsel %vm323_vm0, %v2406_v28, 0.0  ;;  %v1030_v31 = vmul.f32 %v2406_v28, %v2406_v28 }
 0x1e5   : > { %970 = vadd.xlane.f32.xlu2 %v969_v30 }
 0x1e6   : > { %v1056_v33 = vsel %vm323_vm0, %v1030_v31, 0.0 }
 0x1e7   : > { %1057 = vadd.xlane.f32.xlu1 %v1056_v33 }
 0x1e9   : > { %v929_v35 = vpop.f32.mrf.mxu1 }
 0x1ea   : > { %v2414_v38 = vadd.f32 %v929_v35, %v2363_v54 }
 0x1ec   : > { %v972_v37 = vsel %vm323_vm0, %v2414_v38, 0.0  ;;  %v1031_v40 = vmul.f32 %v2414_v38, %v2414_v38 }
 0x1ed   : > { %973 = vadd.xlane.f32.xlu2 %v972_v37 }
 0x1ee   : > { %v1059_v41 = vsel %vm323_vm0, %v1031_v40, 0.0 }
 0x1ef   : > { %1060 = vadd.xlane.f32.xlu1 %v1059_v41  ;;  %v1696_v41 = vld [vmem:[%s2752_s5] sm:$0xff] }
 0x1f0   : > { %1454 = vmatpush.bf16.msra.mxu2 %v1696_v41  ;;  %1706 = vmatpush.bf16.msra.mxu3 %v1696_v41 }
 0x1f1   : > { %v931_v18 = vpop.f32.mrf.mxu1 }
 0x1f2   : > { %v2422_v13 = vadd.f32 %v931_v18, %v2363_v54 }
 0x1f4   : > { %v975_v34 = vsel %vm323_vm0, %v2422_v13, 0.0  ;;  %v1032_v49 = vmul.f32 %v2422_v13, %v2422_v13 }
 0x1f5   : > { %976 = vadd.xlane.f32.xlu0 %v975_v34 }
 0x1f6   : > { %v1062_v0 = vsel %vm323_vm0, %v1032_v49, 0.0 }
 0x1f7   : > { %1063 = vadd.xlane.f32.xlu2 %v1062_v0 }
 0x1f9   : > { %v934_v15 = vpop.f32.mrf.mxu1 }
 0x1fa   : > { %v2430_v16 = vadd.f32 %v934_v15, %v2363_v54 }
 0x1fc   : > { %v978_v46 = vsel %vm323_vm0, %v2430_v16, 0.0  ;;  %v1033_v47 = vmul.f32 %v2430_v16, %v2430_v16 }
 0x1fd   : > { %979 = vadd.xlane.f32.xlu0 %v978_v46 }
 0x1fe   : > { %v1065_v48 = vsel %vm323_vm0, %v1033_v47, 0.0 }
 0x1ff   : > { %1066 = vadd.xlane.f32.xlu2 %v1065_v48 }
 0x201   : > { %v936_v50 = vpop.f32.mrf.mxu1 }
 0x202   : > { %v2438_v51 = vadd.f32 %v936_v50, %v2363_v54 }
 0x204   : > { %v981_v27 = vsel %vm323_vm0, %v2438_v51, 0.0  ;;  %v1034_v53 = vmul.f32 %v2438_v51, %v2438_v51 }
 0x205   : > { %982 = vadd.xlane.f32.xlu1 %v981_v27 }
 0x206   : > { %v1068_v56 = vsel %vm323_vm0, %v1034_v53, 0.0 }
 0x207   : > { %1069 = vadd.xlane.f32.xlu0 %v1068_v56 }
 0x21f   : > { %v944_v63 = vpop.f32.mrf.mxu3 }
 0x220   : > { %v2453_v60 = vadd.f32 %v944_v63, %v2363_v54 }
 0x221   : > { %v939_v5 = vpop.f32.mrf.mxu1 }
 0x222   : > { %v2446_v32 = vadd.f32 %v939_v5, %v2363_v54  ;;  %v1037_v57 = vmul.f32 %v2453_v60, %v2453_v60  ;;  %v990_v59 = vsel %vm323_vm0, %v2453_v60, 0.0 }
 0x224   : > { %v984_v2 = vsel %vm323_vm0, %v2446_v32, 0.0  ;;  %v1035_v29 = vmul.f32 %v2446_v32, %v2446_v32  ;;  %v1077_v6 = vsel %vm323_vm0, %v1037_v57, 0.0 }
 0x225   : > { %985 = vadd.xlane.f32.xlu1 %v984_v2 }
 0x226   : > { %v1071_v61 = vsel %vm323_vm0, %v1035_v29, 0.0 }
 0x227   : > { %1072 = vadd.xlane.f32.xlu0 %v1071_v61  ;;  %v946_v4 = vpop.f32.mrf.mxu3 }
 0x228   : > { %v2473_v19 = vadd.f32 %v946_v4, %v2363_v54 }
 0x229   : > { %v941_v62 = vpop.f32.mrf.mxu1 }
 0x22a   : > { %v2457_v23 = vadd.f32 %v941_v62, %v2363_v54  ;;  %v993_v30 = vsel %vm323_vm0, %v2473_v19, 0.0  ;;  %v1038_v49 = vmul.f32 %v2473_v19, %v2473_v19 }
 0x22c   : > { %v987_v44 = vsel %vm323_vm0, %v2457_v23, 0.0  ;;  %v1036_v55 = vmul.f32 %v2457_v23, %v2457_v23  ;;  %v1080_v50 = vsel %vm323_vm0, %v1038_v49, 0.0 }
 0x22d   : > { %988 = vadd.xlane.f32.xlu2 %v987_v44 }
 0x22e   : > { %v1074_v7 = vsel %vm323_vm0, %v1036_v55, 0.0 }
 0x22f   : > { %1078 = vadd.xlane.f32.xlu0 %v1077_v6  ;;  %1075 = vadd.xlane.f32.xlu1 %v1074_v7 }
 0x230   : > { %v956_v26 = vpop.xlane.xlu2 %955 }
 0x231   : > { %v2470_v12 = vmul.f32 %v2467_v11, %v956_v26  ;;  %v949_v9 = vpop.f32.mrf.mxu3 }
 0x232   : > { %v2476_v20 = vadd.f32 %v949_v9, %v2363_v54  ;;  %v1043_v36 = vpop.xlane.xlu1 %1042 }
 0x233   : > { %v1105_v43 = vmul.f32 %v2470_v12, %v2470_v12  ;;  %v1089_v24 = vmul.f32 %v1043_v36, %v2467_v11  ;;  %v1137_v36 = vsub.f32 %v2366_v52, %v2470_v12 }
 0x234   : > { %v996_v31 = vsel %vm323_vm0, %v2476_v20, 0.0  ;;  %v1039_v25 = vmul.f32 %v2476_v20, %v2476_v20 }
 0x235   : > { %v1121_v21 = vsub.f32 %v1089_v24, %v1105_v43  ;;  %991 = vadd.xlane.f32.xlu2 %v990_v59 }
 0x236   : > { %v1083_v61 = vsel %vm323_vm0, %v1039_v25, 0.0 }
 0x237   : > { %v1153_v33 = vadd.f32 1e-05, %v1121_v21  ;;  %994 = vadd.xlane.f32.xlu0 %v993_v30  ;;  %997 = vadd.xlane.f32.xlu1 %v996_v31  ;;  %v2528_v21 = vperm.slane %v2360_v42, 1 }
 0x238   : > { %v959_v35 = vpop.xlane.xlu0 %958 }
 0x239   : > { %1787 = vrsqrt.f32 %v1153_v33  ;;  %v2491_v37 = vmul.f32 %v2467_v11, %v959_v35  ;;  %v951_v40 = vpop.f32.mrf.mxu3  ;;  %vm1175_vm10 = vweird.f32 %v1153_v33 }
 0x23a   : > { %v2497_v18 = vadd.f32 %v951_v40, %v2363_v54  ;;  %v1046_v34 = vpop.xlane.xlu2 %1045  ;;  %v2531_v40 = vperm.slane %v2360_v42, 2 }
 0x23b   : > { %v1106_v0 = vmul.f32 %v2491_v37, %v2491_v37  ;;  %v1090_v15 = vmul.f32 %v1046_v34, %v2467_v11  ;;  %v1138_v34 = vsub.f32 %v2374_v3, %v2491_v37 }
 0x23c   : > { %v999_v46 = vsel %vm323_vm0, %v2497_v18, 0.0  ;;  %v1040_v47 = vmul.f32 %v2497_v18, %v2497_v18 }
 0x23d   : > { %v1122_v48 = vsub.f32 %v1090_v15, %v1106_v0  ;;  %1000 = vadd.xlane.f32.xlu2 %v999_v46 }
 0x23e   : > { %v1086_v54 = vsel %vm323_vm0, %v1040_v47, 0.0 }
 0x23f   : > { %v1788_v27 = vpop.eup %1787  ;;  %v1154_v53 = vadd.f32 1e-05, %v1122_v48  ;;  %1087 = vadd.xlane.f32.xlu0 %v1086_v54  ;;  %1081 = vadd.xlane.f32.xlu1 %v1080_v50 }
 0x240   : > { %v1170_v56 = vmul.f32 %v1788_v27, %v1153_v33  ;;  %v962_v39 = vpop.xlane.xlu0 %961  ;;  %vm1176_vm9 = vweird.f32 %v1788_v27 }
 0x241   : > { %1789 = vrsqrt.f32 %v1154_v53  ;;  %v2513_v58 = vmul.f32 %v2467_v11, %v962_v39  ;;  %vm1177_vm11 = vmor %vm1175_vm10, %vm1176_vm9  ;;  %vm1185_vm13 = vweird.f32 %v1154_v53 }
 0x242   : > { %v1171_v63 = vmul.f32 %v1788_v27, %v1170_v56  ;;  %v1049_v5 = vpop.xlane.xlu2 %1048 }
 0x243   : > { %v1107_v45 = vmul.f32 %v2513_v58, %v2513_v58  ;;  %v1091_v2 = vmul.f32 %v1049_v5, %v2467_v11 }
 0x244   : > { %v1172_v29 = vmul.f32 0.5, %v1171_v63 }
 0x245   : > { %v1123_v1 = vsub.f32 %v1091_v2, %v1107_v45  ;;  %1084 = vadd.xlane.f32.xlu2 %v1083_v61 }
 0x246   : > { %v1173_v4 = vsub.f32 1.5, %v1172_v29 }
 0x247   : > { %v1790_v62 = vpop.eup %1789  ;;  %v1155_v57 = vadd.f32 1e-05, %v1123_v1 }
 0x248   : > { %v1174_v10 = vmul.f32 %v1788_v27, %v1173_v4  ;;  %v1180_v44 = vmul.f32 %v1790_v62, %v1154_v53  ;;  %v965_v55 = vpop.xlane.xlu1 %964  ;;  %vm1186_vm12 = vweird.f32 %v1790_v62 }
 0x249   : > { %1791 = vrsqrt.f32 %v1155_v57  ;;  %v2520_v6 = vmul.f32 %v2467_v11, %v965_v55  ;;  %vm1187_vm14 = vmor %vm1185_vm13, %vm1186_vm12  ;;  %vm1195_vm2 = vweird.f32 %v1155_v57 }
 0x24a   : > { %v1178_v7 = vsel %vm1177_vm11, %v1788_v27, %v1174_v10  ;;  %v1181_v26 = vmul.f32 %v1790_v62, %v1180_v44  ;;  %v1052_v9 = vpop.xlane.xlu0 %1051  ;;  %v1139_v10 = vsub.f32 %v2382_v8, %v2513_v58 }
 0x24b   : > { %v1108_v43 = vmul.f32 %v2520_v6, %v2520_v6  ;;  %v1092_v24 = vmul.f32 %v1052_v9, %v2467_v11  ;;  %v1329_v30 = vmul.f32 %v1178_v7, %v1137_v36  ;;  %v1140_v8 = vsub.f32 %v2390_v14, %v2520_v6 }
 0x24c   : > { %v1182_v59 = vmul.f32 0.5, %v1181_v26 }
 0x24d   : > { %v1124_v17 = vsub.f32 %v1092_v24, %v1108_v43  ;;  %v1346_v0 = vmul.f32 %v2528_v21, %v1329_v30 }
 0x24e   : > { %v1183_v31 = vsub.f32 1.5, %v1182_v59 }
 0x24f   : > { %v1792_v33 = vpop.eup %1791  ;;  %v1156_v35 = vadd.f32 1e-05, %v1124_v17  ;;  %v1363_v37 = vadd.f32 %v2531_v40, %v1346_v0 }
 0x250   : > { %v1184_v41 = vmul.f32 %v1790_v62, %v1183_v31  ;;  %v1190_v52 = vmul.f32 %v1792_v33, %v1155_v57  ;;  %v968_v12 = vpop.xlane.xlu1 %967  ;;  %vm1196_vm15 = vweird.f32 %v1792_v33 }
 0x251   : > { %1793 = vrsqrt.f32 %v1156_v35  ;;  %v2536_v49 = vmul.f32 %v2467_v11, %v968_v12  ;;  %vm1197_vm3 = vmor %vm1195_vm2, %vm1196_vm15  ;;  %v1379_v29 = vmax.f32 %v1363_v37, 0.0  ;;  %vm1205_vm5 = vweird.f32 %v1156_v35 }
 0x252   : > { %v1188_v15 = vsel %vm1187_vm14, %v1790_v62, %v1184_v41  ;;  %v1191_v46 = vmul.f32 %v1792_v33, %v1190_v52  ;;  %v1055_v47 = vpop.xlane.xlu0 %1054 }
 0x253   : > { %v1109_v42 = vmul.f32 %v2536_v49, %v2536_v49  ;;  %v1093_v48 = vmul.f32 %v1055_v47, %v2467_v11  ;;  %v1330_v54 = vmul.f32 %v1188_v15, %v1138_v34 }
 0x254   : > { %v1192_v50 = vmul.f32 0.5, %v1191_v46 }
 0x255   : > { %v1125_v27 = vsub.f32 %v1093_v48, %v1109_v42  ;;  %v1347_v3 = vmul.f32 %v2528_v21, %v1330_v54 }
 0x256   : > { %v1193_v53 = vsub.f32 1.5, %v1192_v50 }
 0x257   : > { %v1794_v56 = vpop.eup %1793  ;;  %v1157_v39 = vadd.f32 1e-05, %v1125_v27  ;;  %v1364_v25 = vadd.f32 %v2531_v40, %v1347_v3 }
 0x258   : > { %v1194_v63 = vmul.f32 %v1792_v33, %v1193_v53  ;;  %v1200_v5 = vmul.f32 %v1794_v56, %v1156_v35  ;;  %v971_v45 = vpop.xlane.xlu2 %970  ;;  %vm1206_vm4 = vweird.f32 %v1794_v56 }
 0x259   : > { %1795 = vrsqrt.f32 %v1157_v39  ;;  %v2546_v2 = vmul.f32 %v2467_v11, %v971_v45  ;;  %v1380_v61 = vmax.f32 %v1364_v25, 0.0  ;;  %vm1207_vm6 = vmor %vm1205_vm5, %vm1206_vm4  ;;  %vm1215_vm8 = vweird.f32 %v1157_v39 }
 0x25a   : > { %v1198_v1 = vsel %vm1197_vm3, %v1792_v33, %v1194_v63  ;;  %v1201_v4 = vmul.f32 %v1794_v56, %v1200_v5  ;;  %v1058_v62 = vpop.xlane.xlu1 %1057  ;;  %v1141_v5 = vsub.f32 %v2398_v22, %v2536_v49 }
 0x25b   : > { %v1110_v44 = vmul.f32 %v2546_v2, %v2546_v2  ;;  %v1094_v57 = vmul.f32 %v1058_v62, %v2467_v11  ;;  %v1400_v55 = vpack.c.bf16 %v1380_v61, %v1379_v29  ;;  %v1331_v9 = vmul.f32 %v1198_v1, %v1139_v10 }
 0x25c   : > { %v1202_v7 = vmul.f32 0.5, %v1201_v4  ;;  %v1142_v22 = vsub.f32 %v2406_v28, %v2546_v2 }
 0x25d   : > { %v1126_v26 = vsub.f32 %v1094_v57, %v1110_v44  ;;  %1677 = vmatmul.msk.bf16.vlgmr.msra.gmra.mxu2 %vm323_vm0, %v1400_v55  ;;  %v1348_v31 = vmul.f32 %v2528_v21, %v1331_v9 }
 0x25e   : > { %v1203_v36 = vsub.f32 1.5, %v1202_v7 }
 0x25f   : > { %v1796_v43 = vpop.eup %1795  ;;  %v1158_v24 = vadd.f32 1e-05, %v1126_v26  ;;  %v1365_v6 = vadd.f32 %v2531_v40, %v1348_v31 }
 0x260   : > { %v1204_v59 = vmul.f32 %v1794_v56, %v1203_v36  ;;  %v1210_v17 = vmul.f32 %v1796_v43, %v1157_v39  ;;  %v974_v30 = vpop.xlane.xlu2 %973  ;;  %vm1216_vm7 = vweird.f32 %v1796_v43 }
 0x261   : > { %1797 = vrsqrt.f32 %v1158_v24  ;;  %v2557_v58 = vmul.f32 %v2467_v11, %v974_v30  ;;  %vm1217_vm1 = vmor %vm1215_vm8, %vm1216_vm7  ;;  %v1381_v37 = vmax.f32 %v1365_v6, 0.0  ;;  %vm1225_vm10 = vweird.f32 %v1158_v24 }
 0x262   : > { %v1208_v33 = vsel %vm1207_vm6, %v1794_v56, %v1204_v59  ;;  %v1211_v41 = vmul.f32 %v1796_v43, %v1210_v17  ;;  %v1061_v52 = vpop.xlane.xlu1 %1060 }
 0x263   : > { %v1111_v12 = vmul.f32 %v2557_v58, %v2557_v58  ;;  %v1095_v35 = vmul.f32 %v1061_v52, %v2467_v11  ;;  %v1332_v34 = vmul.f32 %v1208_v33, %v1140_v8 }
 0x264   : > { %v1212_v0 = vmul.f32 0.5, %v1211_v41 }
 0x265   : > { %v1127_v15 = vsub.f32 %v1095_v35, %v1111_v12  ;;  %v1349_v14 = vmul.f32 %v2528_v21, %v1332_v34 }
 0x266   : > { %v1213_v46 = vsub.f32 1.5, %v1212_v0 }
 0x267   : > { %v1798_v47 = vpop.eup %1797  ;;  %v1159_v42 = vadd.f32 1e-05, %v1127_v15  ;;  %v1366_v48 = vadd.f32 %v2531_v40, %v1349_v14 }
 0x268   : > { %v1214_v54 = vmul.f32 %v1796_v43, %v1213_v46  ;;  %v1220_v50 = vmul.f32 %v1798_v47, %v1158_v24  ;;  %v977_v27 = vpop.xlane.xlu0 %976  ;;  %vm1226_vm9 = vweird.f32 %v1798_v47  ;;  %v1143_v46 = vsub.f32 %v2414_v38, %v2557_v58 }
 0x269   : > { %1799 = vrsqrt.f32 %v1159_v42  ;;  %v2567_v3 = vmul.f32 %v2467_v11, %v977_v27  ;;  %v1382_v53 = vmax.f32 %v1366_v48, 0.0  ;;  %vm1227_vm11 = vmor %vm1225_vm10, %vm1226_vm9  ;;  %vm1235_vm13 = vweird.f32 %v1159_v42 }
 0x26a   : > { %v1218_v56 = vsel %vm1217_vm1, %v1796_v43, %v1214_v54  ;;  %v1221_v25 = vmul.f32 %v1798_v47, %v1220_v50  ;;  %v1064_v63 = vpop.xlane.xlu2 %1063 }
 0x26b   : > { %v1112_v45 = vmul.f32 %v2567_v3, %v2567_v3  ;;  %v1096_v39 = vmul.f32 %v1064_v63, %v2467_v11  ;;  %v1401_v29 = vpack.c.bf16 %v1382_v53, %v1381_v37  ;;  %v1333_v4 = vmul.f32 %v1218_v56, %v1141_v5 }
 0x26c   : > { %v1222_v61 = vmul.f32 0.5, %v1221_v25  ;;  %v1144_v38 = vsub.f32 %v2422_v13, %v2567_v3 }
 0x26d   : > { %v1128_v1 = vsub.f32 %v1096_v39, %v1112_v45  ;;  %1678 = vmatmul.msk.bf16.gmra.mxu2 %vm323_vm0, %v1401_v29  ;;  %v1350_v7 = vmul.f32 %v2528_v21, %v1333_v4 }
 0x26e   : > { %v1223_v62 = vsub.f32 1.5, %v1222_v61 }
 0x26f   : > { %v1800_v10 = vpop.eup %1799  ;;  %v1160_v44 = vadd.f32 1e-05, %v1128_v1  ;;  %v1367_v2 = vadd.f32 %v2531_v40, %v1350_v7 }
 0x270   : > { %v1224_v57 = vmul.f32 %v1798_v47, %v1223_v62  ;;  %v1230_v55 = vmul.f32 %v1800_v10, %v1159_v42  ;;  %v980_v49 = vpop.xlane.xlu0 %979  ;;  %vm1236_vm12 = vweird.f32 %v1800_v10 }
 0x271   : > { %1801 = vrsqrt.f32 %v1160_v44  ;;  %v2579_v36 = vmul.f32 %v2467_v11, %v980_v49  ;;  %vm1237_vm14 = vmor %vm1235_vm13, %vm1236_vm12  ;;  %v1383_v0 = vmax.f32 %v1367_v2, 0.0  ;;  %vm1245_vm2 = vweird.f32 %v1160_v44 }
 0x272   : > { %v1228_v26 = vsel %vm1227_vm11, %v1798_v47, %v1224_v57  ;;  %v1231_v9 = vmul.f32 %v1800_v10, %v1230_v55  ;;  %v1067_v43 = vpop.xlane.xlu2 %1066 }
 0x273   : > { %v1334_v59 = vmul.f32 %v1228_v26, %v1142_v22  ;;  %v1113_v24 = vmul.f32 %v2579_v36, %v2579_v36  ;;  %v1097_v30 = vmul.f32 %v1067_v43, %v2467_v11 }
 0x274   : > { %v1232_v17 = vmul.f32 0.5, %v1231_v9  ;;  %v1145_v9 = vsub.f32 %v2430_v16, %v2579_v36 }
 0x275   : > { %v1351_v28 = vmul.f32 %v2528_v21, %v1334_v59  ;;  %v1129_v31 = vsub.f32 %v1097_v30, %v1113_v24 }
 0x276   : > { %v1233_v8 = vsub.f32 1.5, %v1232_v17 }
 0x277   : > { %v1802_v33 = vpop.eup %1801  ;;  %v1368_v41 = vadd.f32 %v2531_v40, %v1351_v28  ;;  %v1161_v35 = vadd.f32 1e-05, %v1129_v31 }
 0x278   : > { %v1234_v52 = vmul.f32 %v1800_v10, %v1233_v8  ;;  %v1240_v12 = vmul.f32 %v1802_v33, %v1160_v44  ;;  %v983_v34 = vpop.xlane.xlu1 %982  ;;  %vm1246_vm15 = vweird.f32 %v1802_v33 }
 0x279   : > { %v1384_v15 = vmax.f32 %v1368_v41, 0.0  ;;  %1803 = vrsqrt.f32 %v1161_v35  ;;  %v1018_v47 = vmul.f32 %v2467_v11, %v983_v34  ;;  %vm1247_vm3 = vmor %vm1245_vm2, %vm1246_vm15  ;;  %vm1255_vm5 = vweird.f32 %v1161_v35 }
 0x27a   : > { %v1238_v14 = vsel %vm1237_vm14, %v1800_v10, %v1234_v52  ;;  %v1241_v6 = vmul.f32 %v1802_v33, %v1240_v12  ;;  %v1070_v48 = vpop.xlane.xlu0 %1069 }
 0x27b   : > { %v1402_v54 = vpack.c.bf16 %v1384_v15, %v1383_v0  ;;  %v1098_v27 = vmul.f32 %v1070_v48, %v2467_v11  ;;  %v1114_v42 = vmul.f32 %v1018_v47, %v1018_v47  ;;  %v1335_v37 = vmul.f32 %v1238_v14, %v1143_v46 }
 0x27c   : > { %v1242_v50 = vmul.f32 0.5, %v1241_v6  ;;  %v1146_v30 = vsub.f32 %v2438_v51, %v1018_v47 }
 0x27d   : > { %1679 = vmatmul.msk.bf16.gmra.mxu2 %vm323_vm0, %v1402_v54  ;;  %v1130_v56 = vsub.f32 %v1098_v27, %v1114_v42  ;;  %v1352_v45 = vmul.f32 %v2528_v21, %v1335_v37 }
 0x27e   : > { %v1243_v53 = vsub.f32 1.5, %v1242_v50 }
 0x27f   : > { %v1804_v25 = vpop.eup %1803  ;;  %v1162_v5 = vadd.f32 1e-05, %v1130_v56  ;;  %v1369_v62 = vadd.f32 %v2531_v40, %v1352_v45 }
 0x280   : > { %v1244_v63 = vmul.f32 %v1802_v33, %v1243_v53  ;;  %v1250_v58 = vmul.f32 %v1804_v25, %v1161_v35  ;;  %vm1256_vm4 = vweird.f32 %v1804_v25 }
 0x281   : > { %1805 = vrsqrt.f32 %v1162_v5  ;;  %v1385_v3 = vmax.f32 %v1369_v62, 0.0  ;;  %vm1257_vm6 = vmor %vm1255_vm5, %vm1256_vm4  ;;  %vm1265_vm8 = vweird.f32 %v1162_v5 }
 0x282   : > { %v1248_v39 = vsel %vm1247_vm3, %v1802_v33, %v1244_v63  ;;  %v1251_v29 = vmul.f32 %v1804_v25, %v1250_v58 }
 0x283   : > { %v1336_v61 = vmul.f32 %v1248_v39, %v1144_v38 }
 0x284   : > { %v1252_v1 = vmul.f32 0.5, %v1251_v29 }
 0x285   : > { %v1353_v4 = vmul.f32 %v2528_v21, %v1336_v61 }
 0x286   : > { %v1253_v10 = vsub.f32 1.5, %v1252_v1 }
 0x287   : > { %v1370_v44 = vadd.f32 %v2531_v40, %v1353_v4  ;;  %v1806_v57 = vpop.eup %1805 }
 0x288   : > { %v1254_v13 = vmul.f32 %v1804_v25, %v1253_v10  ;;  %v1260_v22 = vmul.f32 %v1806_v57, %v1162_v5  ;;  %vm1266_vm7 = vweird.f32 %v1806_v57 }
 0x289   : > { %v1386_v55 = vmax.f32 %v1370_v44, 0.0  ;;  %vm1267_vm1 = vmor %vm1265_vm8, %vm1266_vm7 }
 0x28a   : > { %v1258_v7 = vsel %vm1257_vm6, %v1804_v25, %v1254_v13  ;;  %v1261_v26 = vmul.f32 %v1806_v57, %v1260_v22 }
 0x28b   : > { %v1403_v49 = vpack.c.bf16 %v1386_v55, %v1385_v3  ;;  %v1337_v59 = vmul.f32 %v1258_v7, %v1145_v9 }
 0x28c   : > { %v1262_v43 = vmul.f32 0.5, %v1261_v26 }
 0x28d   : > { %1680 = vmatmul.msk.bf16.gmra.mxu2 %vm323_vm0, %v1403_v49  ;;  %v1354_v28 = vmul.f32 %v2528_v21, %v1337_v59 }
 0x28e   : > { %v1263_v17 = vsub.f32 1.5, %v1262_v43 }
 0x28f   : > { %v1371_v33 = vadd.f32 %v2531_v40, %v1354_v28 }
 0x290   : > { %v1264_v24 = vmul.f32 %v1806_v57, %v1263_v17 }
 0x291   : > { %v1387_v34 = vmax.f32 %v1371_v33, 0.0 }
 0x292   : > { %v1268_v2 = vsel %vm1267_vm1, %v1806_v57, %v1264_v24 }
 0x293   : > { %v1338_v8 = vmul.f32 %v1268_v2, %v1146_v30 }
 0x295   : > { %v1355_v31 = vmul.f32 %v2528_v21, %v1338_v8 }
 0x297   : > { %v1372_v41 = vadd.f32 %v2531_v40, %v1355_v31 }
 0x298   : > { %v986_v16 = vpop.xlane.xlu1 %985 }
 0x299   : > { %v1019_v36 = vmul.f32 %v2467_v11, %v986_v16  ;;  %v1388_v51 = vmax.f32 %v1372_v41, 0.0 }
 0x29a   : > { %v1073_v52 = vpop.xlane.xlu0 %1072 }
 0x29b   : > { %v1115_v12 = vmul.f32 %v1019_v36, %v1019_v36  ;;  %v1099_v35 = vmul.f32 %v1073_v52, %v2467_v11  ;;  %v1404_v15 = vpack.c.bf16 %v1388_v51, %v1387_v34  ;;  %v1147_v55 = vsub.f32 %v2446_v32, %v1019_v36 }
 0x29d   : > { %v1131_v0 = vsub.f32 %v1099_v35, %v1115_v12  ;;  %1681 = vmatmul.msk.bf16.gmra.mxu2 %vm323_vm0, %v1404_v15 }
 0x29f   : > { %v1163_v14 = vadd.f32 1e-05, %v1131_v0 }
 0x2a0   : > { %v989_v6 = vpop.xlane.xlu2 %988 }
 0x2a1   : > { %1807 = vrsqrt.f32 %v1163_v14  ;;  %v2610_v46 = vmul.f32 %v2467_v11, %v989_v6  ;;  %vm1275_vm10 = vweird.f32 %v1163_v14 }
 0x2a2   : > { %v1076_v47 = vpop.xlane.xlu1 %1075  ;;  %v1079_v48 = vpop.xlane.xlu0 %1078 }
 0x2a3   : > { %v1116_v54 = vmul.f32 %v2610_v46, %v2610_v46  ;;  %v1100_v50 = vmul.f32 %v1076_v47, %v2467_v11  ;;  %v1101_v5 = vmul.f32 %v1079_v48, %v2467_v11  ;;  %v1148_v36 = vsub.f32 %v2457_v23, %v2610_v46 }
 0x2a5   : > { %v1132_v27 = vsub.f32 %v1100_v50, %v1116_v54 }
 0x2a7   : > { %v1808_v42 = vpop.eup %1807  ;;  %v1164_v37 = vadd.f32 1e-05, %v1132_v27 }
 0x2a8   : > { %v1270_v53 = vmul.f32 %v1808_v42, %v1163_v14  ;;  %v992_v56 = vpop.xlane.xlu2 %991  ;;  %vm1276_vm9 = vweird.f32 %v1808_v42 }
 0x2a9   : > { %1809 = vrsqrt.f32 %v1164_v37  ;;  %v2616_v25 = vmul.f32 %v2467_v11, %v992_v56  ;;  %vm2624_vm11 = vmor %vm1275_vm10, %vm1276_vm9  ;;  %vm1285_vm13 = vweird.f32 %v1164_v37 }
 0x2aa   : > { %v1271_v63 = vmul.f32 %v1808_v42, %v1270_v53  ;;  %v998_v38 = vpop.xlane.xlu1 %997  ;;  %v995_v58 = vpop.xlane.xlu0 %994 }
 0x2ab   : > { %v1117_v45 = vmul.f32 %v2616_v25, %v2616_v25  ;;  %v2622_v62 = vmul.f32 %v2467_v11, %v995_v58  ;;  %v2641_v30 = vmul.f32 %v2467_v11, %v998_v38 }
 0x2ac   : > { %v1272_v39 = vmul.f32 0.5, %v1271_v63 }
 0x2ad   : > { %v1133_v29 = vsub.f32 %v1101_v5, %v1117_v45  ;;  %v1118_v9 = vmul.f32 %v2622_v62, %v2622_v62  ;;  %v1119_v35 = vmul.f32 %v2641_v30, %v2641_v30  ;;  %v1149_v5 = vsub.f32 %v2453_v60, %v2616_v25 }
 0x2ae   : > { %v1273_v61 = vsub.f32 1.5, %v1272_v39  ;;  %v1150_v60 = vsub.f32 %v2473_v19, %v2622_v62  ;;  %v1151_v19 = vsub.f32 %v2476_v20, %v2641_v30 }
 0x2af   : > { %v1810_v1 = vpop.eup %1809  ;;  %v1165_v4 = vadd.f32 1e-05, %v1133_v29 }
 0x2b0   : > { %v1274_v10 = vmul.f32 %v1808_v42, %v1273_v61  ;;  %v1280_v44 = vmul.f32 %v1810_v1, %v1164_v37  ;;  %v1001_v57 = vpop.xlane.xlu2 %1000  ;;  %vm1286_vm12 = vweird.f32 %v1810_v1 }
 0x2b1   : > { %1811 = vrsqrt.f32 %v1165_v4  ;;  %v2629_v3 = vmul.f32 %v2467_v11, %v1001_v57  ;;  %vm1287_vm14 = vmor %vm1285_vm13, %vm1286_vm12  ;;  %vm1295_vm2 = vweird.f32 %v1165_v4 }
 0x2b2   : > { %v1278_v22 = vsel %vm2624_vm11, %v1808_v42, %v1274_v10  ;;  %v1281_v49 = vmul.f32 %v1810_v1, %v1280_v44  ;;  %v1082_v7 = vpop.xlane.xlu1 %1081  ;;  %v1088_v26 = vpop.xlane.xlu0 %1087 }
 0x2b3   : > { %v1120_v43 = vmul.f32 %v2629_v3, %v2629_v3  ;;  %v1102_v59 = vmul.f32 %v1082_v7, %v2467_v11  ;;  %v1104_v17 = vmul.f32 %v1088_v26, %v2467_v11  ;;  %v1339_v2 = vmul.f32 %v1278_v22, %v1147_v55 }
 0x2b4   : > { %v1282_v24 = vmul.f32 0.5, %v1281_v49  ;;  %v1152_v49 = vsub.f32 %v2497_v18, %v2629_v3 }
 0x2b5   : > { %v1134_v32 = vsub.f32 %v1102_v59, %v1118_v9  ;;  %v1136_v28 = vsub.f32 %v1104_v17, %v1120_v43  ;;  %v1356_v51 = vmul.f32 %v2528_v21, %v1339_v2 }
 0x2b6   : > { %v1283_v8 = vsub.f32 1.5, %v1282_v24 }
 0x2b7   : > { %v1812_v31 = vpop.eup %1811  ;;  %v1166_v33 = vadd.f32 1e-05, %v1134_v32  ;;  %v1168_v16 = vadd.f32 1e-05, %v1136_v28  ;;  %v1373_v48 = vadd.f32 %v2531_v40, %v1356_v51 }
 0x2b8   : > { %v1284_v41 = vmul.f32 %v1810_v1, %v1283_v8  ;;  %v1290_v52 = vmul.f32 %v1812_v31, %v1165_v4  ;;  %v1085_v12 = vpop.xlane.xlu2 %1084  ;;  %vm1296_vm15 = vweird.f32 %v1812_v31 }
 0x2b9   : > { %1813 = vrsqrt.f32 %v1166_v33  ;;  %v1103_v34 = vmul.f32 %v1085_v12, %v2467_v11  ;;  %vm1297_vm3 = vmor %vm1295_vm2, %vm1296_vm15  ;;  %v1389_v56 = vmax.f32 %v1373_v48, 0.0  ;;  %vm1305_vm6 = vweird.f32 %v1166_v33  ;;  %v2674_v12 = vld [vmem:[%s2753_s6] ss:$0 sm:$0xff] }
 0x2ba   : > { %v1288_v0 = vsel %vm1287_vm14, %v1810_v1, %v1284_v41  ;;  %v1291_v15 = vmul.f32 %v1812_v31, %v1290_v52  ;;  %1815 = vrsqrt.f32 %v1168_v16  ;;  %vm1325_vm8 = vweird.f32 %v1168_v16 }
 0x2bb   : > { %v1135_v14 = vsub.f32 %v1103_v34, %v1119_v35  ;;  %v1340_v6 = vmul.f32 %v1288_v0, %v1148_v36 }
 0x2bc   : > { %v1292_v47 = vmul.f32 0.5, %v1291_v15 }
 0x2bd   : > { %v1167_v23 = vadd.f32 1e-05, %v1135_v14  ;;  %v1357_v46 = vmul.f32 %v2528_v21, %v1340_v6 }
 0x2be   : > { %v1293_v54 = vsub.f32 1.5, %v1292_v47 }
 0x2bf   : > { %v1814_v50 = vpop.eup %1813  ;;  %1817 = vrsqrt.f32 %v1167_v23  ;;  %v1374_v27 = vadd.f32 %v2531_v40, %v1357_v46  ;;  %vm1315_vm10 = vweird.f32 %v1167_v23 }
 0x2c0   : > { %v1816_v11 = vpop.eup %1815  ;;  %v1294_v42 = vmul.f32 %v1812_v31, %v1293_v54  ;;  %v1300_v37 = vmul.f32 %v1814_v50, %v1166_v33  ;;  %vm1306_vm4 = vweird.f32 %v1814_v50 }
 0x2c1   : > { %v1320_v53 = vmul.f32 %v1816_v11, %v1168_v16  ;;  %v1390_v63 = vmax.f32 %v1374_v27, 0.0  ;;  %vm1326_vm5 = vweird.f32 %v1816_v11  ;;  %vm1307_vm7 = vmor %vm1305_vm6, %vm1306_vm4 }
 0x2c2   : > { %v1298_v38 = vsel %vm1297_vm3, %v1812_v31, %v1294_v42  ;;  %v1301_v58 = vmul.f32 %v1814_v50, %v1300_v37  ;;  %vm1327_vm1 = vmor %vm1325_vm8, %vm1326_vm5 }
 0x2c3   : > { %v1321_v45 = vmul.f32 %v1816_v11, %v1320_v53  ;;  %v1405_v39 = vpack.c.bf16 %v1390_v63, %v1389_v56  ;;  %v1341_v1 = vmul.f32 %v1298_v38, %v1149_v5 }
 0x2c4   : > { %v1302_v29 = vmul.f32 0.5, %v1301_v58 }
 0x2c5   : > { %v1818_v61 = vpop.eup %1817  ;;  %v1322_v10 = vmul.f32 0.5, %v1321_v45  ;;  %1682 = vmatmul.msk.bf16.gmra.mxu2 %vm323_vm0, %v1405_v39  ;;  %v1358_v22 = vmul.f32 %v2528_v21, %v1341_v1 }
 0x2c6   : > { %v1303_v44 = vsub.f32 1.5, %v1302_v29  ;;  %v1310_v4 = vmul.f32 %v1818_v61, %v1167_v23  ;;  %vm1316_vm9 = vweird.f32 %v1818_v61 }
 0x2c7   : > { %v1323_v57 = vsub.f32 1.5, %v1322_v10  ;;  %v1375_v32 = vadd.f32 %v2531_v40, %v1358_v22  ;;  %vm1317_vm11 = vmor %vm1315_vm10, %vm1316_vm9 }
 0x2c8   : > { %v1304_v13 = vmul.f32 %v1814_v50, %v1303_v44  ;;  %v1311_v55 = vmul.f32 %v1818_v61, %v1310_v4 }
 0x2c9   : > { %v1324_v25 = vmul.f32 %v1816_v11, %v1323_v57  ;;  %v1391_v8 = vmax.f32 %v1375_v32, 0.0 }
 0x2ca   : > { %v1308_v7 = vsel %vm1307_vm7, %v1814_v50, %v1304_v13  ;;  %v1312_v26 = vmul.f32 0.5, %v1311_v55 }
 0x2cb   : > { %v1328_v9 = vsel %vm1327_vm1, %v1816_v11, %v1324_v25  ;;  %v1342_v43 = vmul.f32 %v1308_v7, %v1150_v60 }
 0x2cc   : > { %v1344_v59 = vmul.f32 %v1328_v9, %v1152_v49  ;;  %v1313_v17 = vsub.f32 1.5, %v1312_v26 }
 0x2cd   : > { %v1359_v24 = vmul.f32 %v2528_v21, %v1342_v43 }
 0x2ce   : > { %v1314_v28 = vmul.f32 %v1818_v61, %v1313_v17  ;;  %v1361_v62 = vmul.f32 %v2528_v21, %v1344_v59 }
 0x2cf   : > { %v1376_v18 = vadd.f32 %v2531_v40, %v1359_v24 }
 0x2d0   : > { %v1318_v3 = vsel %vm1317_vm11, %v1818_v61, %v1314_v28  ;;  %v1378_v36 = vadd.f32 %v2531_v40, %v1361_v62 }
 0x2d1   : > { %v1343_v2 = vmul.f32 %v1318_v3, %v1151_v19  ;;  %v1392_v31 = vmax.f32 %v1376_v18, 0.0 }
 0x2d2   : > { %v1394_v41 = vmax.f32 %v1378_v36, 0.0 }
 0x2d3   : > { %v1360_v33 = vmul.f32 %v2528_v21, %v1343_v2  ;;  %v1406_v16 = vpack.c.bf16 %v1392_v31, %v1391_v8 }
 0x2d5   : > { %1683 = vmatmul.msk.bf16.gmra.mxu2 %vm323_vm0, %v1406_v16  ;;  %v1377_v20 = vadd.f32 %v2531_v40, %v1360_v33 }
 0x2d7   : > { %v1393_v30 = vmax.f32 %v1377_v20, 0.0 }
 0x2d9   : > { %v1407_v52 = vpack.c.bf16 %v1394_v41, %v1393_v30 }
 0x2db   : > { %1684 = vmatmul.msk.bf16.vlgmr.msra.gmra.mxu3 %vm323_vm0, %v1407_v52 }
 0x2e0   : > { %v1456_v35 = vpop.f32.mrf.mxu2 }
 0x2e1   : > { %v1457_v21 = vadd.f32 %v2674_v12, %v1456_v35 }
 0x2e3   : > { %1819 = vtanh.f32 %v1457_v21 }
 0x2e8   : > { %v1458_v34 = vpop.f32.mrf.mxu2 }
 0x2e9   : > { %v1820_v51 = vpop.eup %1819  ;;  %v1459_v40 = vadd.f32 %v2674_v12, %v1458_v34 }
 0x2ea   : > { %v1512_v0 = vmul.f32 2.0, %v1820_v51 }
 0x2eb   : > { %1821 = vtanh.f32 %v1459_v40 }
 0x2ec   : > { %1528 = vst [vmem:[%s2681_s14] sm:$0xff] %v1512_v0 }
 0x2f0   : > { %v1461_v15 = vpop.f32.mrf.mxu2 }
 0x2f1   : > { %v1822_v14 = vpop.eup %1821  ;;  %v1462_v6 = vadd.f32 %v2674_v12, %v1461_v15 }
 0x2f2   : > { %v1513_v47 = vmul.f32 2.0, %v1822_v14 }
 0x2f3   : > { %1823 = vtanh.f32 %v1462_v6 }
 0x2f4   : > { %1529 = vst [vmem:[%s2681_s14 + $0x8] sm:$0xff] %v1513_v47 }
 0x2f8   : > { %v1463_v23 = vpop.f32.mrf.mxu2 }
 0x2f9   : > { %v1824_v46 = vpop.eup %1823  ;;  %v1464_v48 = vadd.f32 %v2674_v12, %v1463_v23 }
 0x2fa   : > { %v1514_v54 = vmul.f32 2.0, %v1824_v46 }
 0x2fb   : > { %1825 = vtanh.f32 %v1464_v48 }
 0x2fc   : > { %1530 = vst [vmem:[%s2681_s14 + $0x10] sm:$0xff] %v1514_v54 }
 0x300   : > { %v1466_v50 = vpop.f32.mrf.mxu2 }
 0x301   : > { %v1826_v27 = vpop.eup %1825  ;;  %v1467_v11 = vadd.f32 %v2674_v12, %v1466_v50 }
 0x302   : > { %v1515_v42 = vmul.f32 2.0, %v1826_v27 }
 0x303   : > { %1827 = vtanh.f32 %v1467_v11 }
 0x304   : > { %1531 = vst [vmem:[%s2681_s14 + $0x18] sm:$0xff] %v1515_v42 }
 0x308   : > { %v1468_v37 = vpop.f32.mrf.mxu2 }
 0x309   : > { %v1828_v53 = vpop.eup %1827  ;;  %v1469_v56 = vadd.f32 %v2674_v12, %v1468_v37 }
 0x30a   : > { %v1516_v63 = vmul.f32 2.0, %v1828_v53 }
 0x30b   : > { %1829 = vtanh.f32 %v1469_v56 }
 0x30c   : > { %1532 = vst [vmem:[%s2681_s14 + $0x20] sm:$0xff] %v1516_v63 }
 0x310   : > { %v1471_v38 = vpop.f32.mrf.mxu2 }
 0x311   : > { %v1830_v58 = vpop.eup %1829  ;;  %v1472_v5 = vadd.f32 %v2674_v12, %v1471_v38 }
 0x312   : > { %v1517_v45 = vmul.f32 2.0, %v1830_v58 }
 0x313   : > { %1831 = vtanh.f32 %v1472_v5 }
 0x314   : > { %1533 = vst [vmem:[%s2681_s14 + $0x28] sm:$0xff] %v1517_v45 }
 0x318   : > { %v1473_v39 = vpop.f32.mrf.mxu2 }
 0x319   : > { %v1832_v29 = vpop.eup %1831  ;;  %v1474_v61 = vadd.f32 %v2674_v12, %v1473_v39 }
 0x31a   : > { %v1518_v1 = vmul.f32 2.0, %v1832_v29 }
 0x31b   : > { %1833 = vtanh.f32 %v1474_v61 }
 0x31c   : > { %1534 = vst [vmem:[%s2681_s14 + $0x30] sm:$0xff] %v1518_v1 }
 0x320   : > { %v1476_v4 = vpop.f32.mrf.mxu2 }
 0x321   : > { %v1834_v10 = vpop.eup %1833  ;;  %v1477_v57 = vadd.f32 %v2674_v12, %v1476_v4 }
 0x322   : > { %v1519_v44 = vmul.f32 2.0, %v1834_v10 }
 0x323   : > { %1835 = vtanh.f32 %v1477_v57 }
 0x324   : > { %1535 = vst [vmem:[%s2681_s14 + $0x38] sm:$0xff] %v1519_v44 }
 0x328   : > { %v1478_v13 = vpop.f32.mrf.mxu2 }
 0x329   : > { %v1836_v55 = vpop.eup %1835  ;;  %v1479_v22 = vadd.f32 %v2674_v12, %v1478_v13 }
 0x32a   : > { %v1520_v60 = vmul.f32 2.0, %v1836_v55 }
 0x32b   : > { %1837 = vtanh.f32 %v1479_v22 }
 0x32c   : > { %1536 = vst [vmem:[%s2681_s14 + $0x40] sm:$0xff] %v1520_v60 }
 0x331   : > { %v1838_v25 = vpop.eup %1837 }
 0x332   : > { %v1521_v49 = vmul.f32 2.0, %v1838_v25 }
 0x334   : > { %1537 = vst [vmem:[%s2681_s14 + $0x48] sm:$0xff] %v1521_v49 }
 0x348   : > { %v1481_v7 = vpop.f32.mrf.mxu2 }
 0x349   : > { %v1482_v26 = vadd.f32 %v2674_v12, %v1481_v7 }
 0x34b   : > { %1839 = vtanh.f32 %v1482_v26 }
 0x350   : > { %v1483_v9 = vpop.f32.mrf.mxu2 }
 0x351   : > { %v1840_v43 = vpop.eup %1839  ;;  %v1484_v59 = vadd.f32 %v2674_v12, %v1483_v9 }
 0x352   : > { %v1522_v17 = vmul.f32 2.0, %v1840_v43 }
 0x353   : > { %1841 = vtanh.f32 %v1484_v59 }
 0x354   : > { %1538 = vst [vmem:[%s2681_s14 + $0x50] sm:$0xff] %v1522_v17 }
 0x358   : > { %v1486_v24 = vpop.f32.mrf.mxu2 }
 0x359   : > { %v1842_v32 = vpop.eup %1841  ;;  %v1487_v28 = vadd.f32 %v2674_v12, %v1486_v24 }
 0x35a   : > { %v1523_v19 = vmul.f32 2.0, %v1842_v32 }
 0x35b   : > { %1843 = vtanh.f32 %v1487_v28 }
 0x35c   : > { %1539 = vst [vmem:[%s2681_s14 + $0x58] sm:$0xff] %v1523_v19 }
 0x35e   : > { %v1491_v62 = vpop.f32.mrf.mxu3 }
 0x35f   : > { %v1492_v18 = vadd.f32 %v2674_v12, %v1491_v62 }
 0x360   : > { %v1488_v3 = vpop.f32.mrf.mxu2 }
 0x361   : > { %v1844_v2 = vpop.eup %1843  ;;  %1845 = vtanh.f32 %v1492_v18  ;;  %v1489_v8 = vadd.f32 %v2674_v12, %v1488_v3 }
 0x362   : > { %v1524_v31 = vmul.f32 2.0, %v1844_v2 }
 0x363   : > { %1847 = vtanh.f32 %v1489_v8 }
 0x364   : > { %1540 = vst [vmem:[%s2681_s14 + $0x60] sm:$0xff] %v1524_v31 }
 0x366   : > { %v1493_v33 = vpop.f32.mrf.mxu3 }
 0x367   : > { %v1846_v16 = vpop.eup %1845  ;;  %v1494_v36 = vadd.f32 %v2674_v12, %v1493_v33 }
 0x368   : > { %v1526_v20 = vmul.f32 2.0, %v1846_v16 }
 0x369   : > { %v1848_v30 = vpop.eup %1847  ;;  %1849 = vtanh.f32 %v1494_v36 }
 0x36a   : > { %1542 = vst [vmem:[%s2681_s14 + $0x70] sm:$0xff] %v1526_v20  ;;  %v1525_v41 = vmul.f32 2.0, %v1848_v30 }
 0x36c   : > { %1541 = vst [vmem:[%s2681_s14 + $0x68] sm:$0xff] %v1525_v41 }
 0x36f   : > { %v1850_v52 = vpop.eup %1849 }
 0x370   : > { %v1527_v35 = vmul.f32 2.0, %v1850_v52 }
 0x372   : > { %1543 = vst [vmem:[%s2681_s14 + $0x78] sm:$0xff] %v1527_v35 }
 0x373   : > { %1878 = shalt.err (!%p1875_p3)
}
 0x374   : > { %s1917_s9 = smov 128   ;;  %s1918_s14 = smov 8  }
 0x375   : > { %1707 = dma.vmem_to_hbm [thread:$0]  (%p1997_p5), %s1558_s19, 2048, %s1560_s20, %s1545_s28, %s1917_s9, %s1917_s9, %s1918_s14  }
 0x376 PF: > { %p1713_p4 = scmp.ge.s32.totalorder %s1913_s27, 2  ;;  %s1574_s16 = sand.u32 1, %s1901_s24  }
 0x377   : > { %s1575_s17 = scalar_lea.sflag [#allocation3], %s1574_s16 }
 0x378   : > { %p1710_p7 = pnand %p1713_p4, %p2001_p6 }
 0x37a   : > { %p1711_p8 = pneg %p1710_p7 }
 0x37c   : > { %1896 = dma.done.wait (%p1711_p8), %s1575_s17, 2048  }
 0x37d   : > { %1898 = vsyncadd (%p1711_p8), %s1575_s17, 4294965248  ;;  %p17_p9 = scmp.ge.s32.totalorder %s1984_s30, 4   ;;  %s2759_s24 = smov %s1905_s25 }
 0x37e   : > { %s2760_s25 = smov %s1909_s26  ;;  %s2761_s26 = smov %s1995_s10 }
 0x37f   : > { %s2762_s27 = smov %s1984_s30  ;;  %19 = sbr.rel (!%p17_p9) target bundleno = 3 (0x3), region = 83 }
 0x384   :  { %1581 = vsyncpa [#allocation3], 1 }
 0x385   :  { %1583 = vsyncpa [#allocation3 + $0x1], 1 }

</bundles_post_ra>
